<compile_context>
chip_gen: v7x
topology: tpu7x:2x2x1
jax: 0.10.0
libtpu: 0.0.40
codegen_flags: <defaults>
</compile_context>

<pallas_src>
import functools

import jax
import jax.numpy as jnp
import numpy as np
from jax.experimental import pallas as pl
from jax.experimental.pallas import tpu as pltpu

# ---------------- synthetic (small) ESM-style config ----------------
VOCAB = 33
PAD_IDX = 1
CLS_IDX = 0
EOS_IDX = 2
EMBED_DIM = 32          # ESM-1b: 1280
NUM_LAYERS = 2          # ESM-1b: 33 (repr layer == final layer, post final LN)
NUM_HEADS = 4           # ESM-1b: 20
HEAD_DIM = EMBED_DIM // NUM_HEADS
FFN_DIM = 64            # ESM-1b: 5120
MAX_POS = 64
LN_EPS = 1e-5
NEG_INF = -1e30

VMEM_LIMIT = 32 * 1024 * 1024   # safe on v5e/v6e/v7x at this toy size


def _ln(x, g, b):
    """Row-wise LayerNorm in f32 (used inside kernels)."""
    mu = jnp.mean(x, axis=-1, keepdims=True)
    xc = x - mu
    var = jnp.mean(xc * xc, axis=-1, keepdims=True)
    return xc * jax.lax.rsqrt(var + LN_EPS) * g + b


# ============================ Pallas kernels ============================

def _encoder_kernel(x_ref, mask_ref, bias_ref, embg_ref, embb_ref,
                    ln1g_ref, ln1b_ref, wqkv_ref, bqkv_ref, wo_ref, bo_ref,
                    ln2g_ref, ln2b_ref, w1_ref, b1_ref, w2_ref, b2_ref,
                    o_ref, *, num_heads, head_dim):
    """One (batch b, layer l) grid step of the fused pre-LN encoder.

    The residual stream is the resident output block (same output block index
    for every layer of a given b); it is initialized with the fused embedding
    LayerNorm at l == 0 and only written back to HBM once per batch element.
    """
    @pl.when(pl.program_id(1) == 0)
    def _():
        # emb_layer_norm_before + zeroing of padded positions, fused here.
        o_ref[0] = _ln(x_ref[0], embg_ref[...], embb_ref[...]) * mask_ref[0]

    x = o_ref[0]                         # (L, D) f32 residual
    bias = bias_ref[0]                   # (1, L) additive key-padding mask
    D = num_heads * head_dim

    # ---- self-attention block (LN1 fused with the fused-QKV matmul) ----
    h = _ln(x, ln1g_ref[0], ln1b_ref[0])
    qkv = jnp.dot(h.astype(jnp.bfloat16), wqkv_ref[0],
                  preferred_element_type=jnp.float32) + bqkv_ref[0]
    # 1/sqrt(head_dim) is pre-folded into the q part of wqkv/bqkv at init.
    q = qkv[:, 0:D]
    k = qkv[:, D:2 * D]
    v = qkv[:, 2 * D:3 * D]
    wo = wo_ref[0]                       # (D, D) bf16

    # Per head: scores -> softmax -> context -> out-projection slice, summed
    # directly into the attention output (no (L, D) head concatenate).
    # TODO(synk): at ESM scale (20 heads, head_dim=64) use a head grid axis or
    # fori_loop instead of a Python unroll to bound vreg live ranges.
    attn = None
    for hh in range(num_heads):
        sl = slice(hh * head_dim, (hh + 1) * head_dim)
        qh = q[:, sl].astype(jnp.bfloat16)
        kh = k[:, sl].astype(jnp.bfloat16)
        vh = v[:, sl].astype(jnp.bfloat16)
        s = jax.lax.dot_general(qh, kh, (((1,), (1,)), ((), ())),
                                preferred_element_type=jnp.float32) + bias
        s = s - jnp.max(s, axis=-1, keepdims=True)
        p = jnp.exp(s)
        p = p * pl.reciprocal(jnp.sum(p, axis=-1, keepdims=True), approx=False)
        ctx = jnp.dot(p.astype(jnp.bfloat16), vh,
                      preferred_element_type=jnp.float32)          # (L, hd)
        part = jnp.dot(ctx.astype(jnp.bfloat16), wo[sl, :],
                       preferred_element_type=jnp.float32)         # (L, D)
        attn = part if attn is None else attn + part
    x = x + attn + bo_ref[0]

    # ---- FFN block (LN2 fused with w1) ----
    h = _ln(x, ln2g_ref[0], ln2b_ref[0])
    f = jnp.dot(h.astype(jnp.bfloat16), w1_ref[0],
                preferred_element_type=jnp.float32) + b1_ref[0]
    # TODO(synk): ESM uses exact (erf) GELU; tanh approximation keeps the
    # transcendental on the EUP and is guaranteed to lower.
    f = jax.nn.gelu(f, approximate=True)
    x = x + jnp.dot(f.astype(jnp.bfloat16), w2_ref[0],
                    preferred_element_type=jnp.float32) + b2_ref[0]

    o_ref[0] = x


def encoder_forward(params, x_emb, maskf, attn_bias):
    B, L, D = x_emb.shape
    F = FFN_DIM
    NL = NUM_LAYERS
    H = NUM_HEADS

    flops_layer = (2 * L * D * 3 * D        # fused QKV
                   + 4 * L * L * D          # scores + context over all heads
                   + 2 * L * D * D          # out projection
                   + 4 * L * D * F)         # FFN (w1 + w2)
    cost = pl.CostEstimate(
        flops=int(B * NL * flops_layer),
        transcendentals=int(B * NL * (H * L * L + L * F)),      # exp + gelu
        bytes_accessed=int(
            NL * (3 * D * D + D * D + 2 * D * F) * 2            # bf16 weights
            + NL * (3 * D + 5 * D + F) * 4                      # biases / LN
            + B * L * D * 4 * 2 + B * L * 4 * 2))               # activations

    const2 = lambda b, l: (0, 0)          # shared (non-layer) params
    per_b3 = lambda b, l: (b, 0, 0)       # per-batch activations
    per_l3 = lambda b, l: (l, 0, 0)       # per-layer stacked weights

    return pl.pallas_call(
        functools.partial(_encoder_kernel, num_heads=H, head_dim=HEAD_DIM),
        out_shape=jax.ShapeDtypeStruct((B, L, D), jnp.float32),
        grid=(B, NL),
        in_specs=[
            pl.BlockSpec((1, L, D), per_b3),         # token+pos embeddings
            pl.BlockSpec((1, L, 1), per_b3),         # padding mask (float)
            pl.BlockSpec((1, 1, L), per_b3),         # additive attention bias
            pl.BlockSpec((1, D), const2),            # emb_ln_g
            pl.BlockSpec((1, D), const2),            # emb_ln_b
            pl.BlockSpec((1, 1, D), per_l3),         # ln1_g
            pl.BlockSpec((1, 1, D), per_l3),         # ln1_b
            pl.BlockSpec((1, D, 3 * D), per_l3),     # wqkv (bf16, q pre-scaled)
            pl.BlockSpec((1, 1, 3 * D), per_l3),     # bqkv
            pl.BlockSpec((1, D, D), per_l3),         # wo (bf16)
            pl.BlockSpec((1, 1, D), per_l3),         # bo
            pl.BlockSpec((1, 1, D), per_l3),         # ln2_g
            pl.BlockSpec((1, 1, D), per_l3),         # ln2_b
            pl.BlockSpec((1, D, F), per_l3),         # w1 (bf16)
            pl.BlockSpec((1, 1, F), per_l3),         # b1
            pl.BlockSpec((1, F, D), per_l3),         # w2 (bf16)
            pl.BlockSpec((1, 1, D), per_l3),         # b2
        ],
        # Same output block for every l  =>  residual stays resident in VMEM
        # across the whole layer stack; written back to HBM once per b.
        out_specs=pl.BlockSpec((1, L, D), per_b3),
        compiler_params=pltpu.CompilerParams(
            dimension_semantics=("parallel", "arbitrary"),
            vmem_limit_bytes=VMEM_LIMIT),
        cost_estimate=cost,
    )(x_emb, maskf, attn_bias,
      params["emb_ln_g"], params["emb_ln_b"],
      params["ln1_g"], params["ln1_b"], params["wqkv"], params["bqkv"],
      params["wo"], params["bo"], params["ln2_g"], params["ln2_b"],
      params["w1"], params["b1"], params["w2"], params["b2"])


def _contact_kernel(x_ref, g_ref, b_ref, wp_ref, cb_ref, o_ref, *, seq_len):
    # Final encoder LayerNorm fused here; cls/eos rows cropped in-kernel.
    # prod-term logits[c][i,j] = sum_d xn[i,d]*wp[c,d]*xn[j,d] + cb[c]
    # The diff-term (x_i - x_j)@Wd is antisymmetric and cancels exactly under
    # the 0.5*(P + P^T) symmetrization, so it is dropped entirely.
    Lc = seq_len - 2
    xc = x_ref[0, pl.ds(1, Lc), :]                       # (Lc, D) crop cls/eos
    xn = _ln(xc, g_ref[...], b_ref[...])
    # Both classes stacked into ONE bf16 MXU matmul (f32 accumulation); the
    # mirror matrix comes from a single XLU transpose, not a second matmul.
    a = jnp.concatenate([xn * wp_ref[0:1, :], xn * wp_ref[1:2, :]], axis=0)
    p = jax.lax.dot_general(a.astype(jnp.bfloat16), xn.astype(jnp.bfloat16),
                            (((1,), (1,)), ((), ())),
                            preferred_element_type=jnp.float32)   # (2*Lc, Lc)
    pt = jnp.transpose(p)                                         # (Lc, 2*Lc)
    cb = cb_ref[...]                                              # (1, 2)
    for c in range(2):
        sym = 0.5 * (p[c * Lc:(c + 1) * Lc, :] + pt[:, c * Lc:(c + 1) * Lc])
        o_ref[0, c] = sym + cb[:, c:c + 1]


def contact_head(x, final_g, final_b, wpT, cbias):
    B, L, D = x.shape
    logits = pl.pallas_call(
        functools.partial(_contact_kernel, seq_len=L),
        out_shape=jax.ShapeDtypeStruct((B, 2, L - 2, L - 2), jnp.float32),
        grid=(B,),
        in_specs=[
            pl.BlockSpec((1, L, D), lambda b: (b, 0, 0)),
            pl.BlockSpec((1, D), lambda b: (0, 0)),
            pl.BlockSpec((1, D), lambda b: (0, 0)),
            pl.BlockSpec((2, D), lambda b: (0, 0)),
            pl.BlockSpec((1, 2), lambda b: (0, 0)),
        ],
        # Class-major output keeps the (Lc, Lc) planes contiguous/lane-dense.
        # TODO(synk): at toy Lc=6 stores are still masked; irrelevant once
        # Lc ~ 1022 at ESM scale.
        out_specs=pl.BlockSpec((1, 2, L - 2, L - 2), lambda b: (b, 0, 0, 0)),
        compiler_params=pltpu.CompilerParams(
            dimension_semantics=("parallel",),
            vmem_limit_bytes=VMEM_LIMIT),
    )(x, final_g, final_b, wpT, cbias)
    # tiny class-major -> class-last transpose (XLA glue)
    return jnp.transpose(logits, (0, 2, 3, 1))          # (B, L-2, L-2, 2)


# ============================ parameters ============================

def init_params(key):
    keys = iter(jax.random.split(key, 256))

    def nrm(shape, scale=0.02):
        return (scale * jax.random.normal(next(keys), shape)).astype(jnp.float32)

    p = {}
    tok = nrm((VOCAB, EMBED_DIM))
    p["tok_emb"] = tok.at[PAD_IDX].set(0.0)             # padding_idx row zeros
    p["pos_emb"] = nrm((MAX_POS + PAD_IDX + 1, EMBED_DIM))
    p["emb_ln_g"] = jnp.ones((1, EMBED_DIM), jnp.float32)
    p["emb_ln_b"] = jnp.zeros((1, EMBED_DIM), jnp.float32)
    p["final_ln_g"] = jnp.ones((1, EMBED_DIM), jnp.float32)
    p["final_ln_b"] = jnp.zeros((1, EMBED_DIM), jnp.float32)

    scale = float(HEAD_DIM) ** -0.5
    ln1_g, ln1_b, wqkv, bqkv, wo, bo = [], [], [], [], [], []
    ln2_g, ln2_b, w1, b1, w2, b2 = [], [], [], [], [], []
    for _ in range(NUM_LAYERS):
        wq = nrm((EMBED_DIM, EMBED_DIM))
        wk = nrm((EMBED_DIM, EMBED_DIM))
        wv = nrm((EMBED_DIM, EMBED_DIM))
        bq, bk, bv = nrm((1, EMBED_DIM)), nrm((1, EMBED_DIM)), nrm((1, EMBED_DIM))
        # fold the 1/sqrt(head_dim) attention scale into the q projection
        # (in f32, BEFORE the bf16 cast).
        wq, bq = wq * scale, bq * scale
        ln1_g.append(jnp.ones((1, EMBED_DIM), jnp.float32))
        ln1_b.append(jnp.zeros((1, EMBED_DIM), jnp.float32))
        wqkv.append(jnp.concatenate([wq, wk, wv], axis=1).astype(jnp.bfloat16))
        bqkv.append(jnp.concatenate([bq, bk, bv], axis=1))
        wo.append(nrm((EMBED_DIM, EMBED_DIM)).astype(jnp.bfloat16))
        bo.append(nrm((1, EMBED_DIM)))
        ln2_g.append(jnp.ones((1, EMBED_DIM), jnp.float32))
        ln2_b.append(jnp.zeros((1, EMBED_DIM), jnp.float32))
        w1.append(nrm((EMBED_DIM, FFN_DIM)).astype(jnp.bfloat16))
        b1.append(nrm((1, FFN_DIM)))
        w2.append(nrm((FFN_DIM, EMBED_DIM)).astype(jnp.bfloat16))
        b2.append(nrm((1, EMBED_DIM)))

    # Per-layer weights stacked on a leading [NUM_LAYERS] axis so the fused
    # encoder kernel's index_maps can select (and the pipeline can prefetch)
    # layer l's blocks while layer l-1 computes.
    p.update(
        ln1_g=jnp.stack(ln1_g), ln1_b=jnp.stack(ln1_b),
        wqkv=jnp.stack(wqkv), bqkv=jnp.stack(bqkv),
        wo=jnp.stack(wo), bo=jnp.stack(bo),
        ln2_g=jnp.stack(ln2_g), ln2_b=jnp.stack(ln2_b),
        w1=jnp.stack(w1), b1=jnp.stack(b1),
        w2=jnp.stack(w2), b2=jnp.stack(b2),
    )

    # PairwiseContactPredictionHead: Linear(2*D, 2)
    w_contact = nrm((2 * EMBED_DIM, 2))
    p["contact_wpT"] = jnp.transpose(w_contact[:EMBED_DIM])   # (2, D) prod part
    p["contact_wdT"] = jnp.transpose(w_contact[EMBED_DIM:])   # (2, D) diff part (ref only)
    p["contact_b"] = nrm((1, 2))
    return p


# ============================ forward pass ============================

def protein_bert_contact_forward(params, input_ids, protein_length):
    # protein_length only enters the loss branch (targets=None here); kept for
    # signature parity with the PyTorch module.
    del protein_length
    mask = (input_ids != PAD_IDX)
    maskf = mask.astype(jnp.float32)
    positions = (jnp.cumsum(mask.astype(jnp.int32), axis=1)
                 * mask.astype(jnp.int32) + PAD_IDX)

    # TODO(synk): embedding gathers stay in XLA glue (no clean Pallas gather at
    # this scale); everything downstream runs in exactly two pallas_calls.
    x = (jnp.take(params["tok_emb"], input_ids, axis=0) +
         jnp.take(params["pos_emb"], positions, axis=0)).astype(jnp.float32)

    attn_bias = ((1.0 - maskf) * NEG_INF)[:, None, :]          # (B, 1, L)
    x = encoder_forward(params, x, maskf[..., None], attn_bias)

    # TODO(synk): nn.Dropout() in the head is identity (eval mode) here; the
    # loss / precision_at_l5 branch (targets is not None) is not implemented.
    return contact_head(x, params["final_ln_g"], params["final_ln_b"],
                        params["contact_wpT"], params["contact_b"])


# ===================== pure-JAX reference (for checking) =====================

def reference_forward(params, input_ids, protein_length):
    del protein_length
    B, L = input_ids.shape
    D = EMBED_DIM
    mask = (input_ids != PAD_IDX)
    maskf = mask.astype(jnp.float32)
    positions = (jnp.cumsum(mask.astype(jnp.int32), axis=1)
                 * mask.astype(jnp.int32) + PAD_IDX)

    def ln(x, g, b):
        mu = jnp.mean(x, axis=-1, keepdims=True)
        xc = x - mu
        var = jnp.mean(xc * xc, axis=-1, keepdims=True)
        return xc * jax.lax.rsqrt(var + LN_EPS) * g + b

    def mm(a, w):  # bf16 MXU inputs, f32 accumulation (mirrors the kernels)
        return jnp.dot(a.astype(jnp.bfloat16), w.astype(jnp.bfloat16),
                       preferred_element_type=jnp.float32)

    x = (jnp.take(params["tok_emb"], input_ids, axis=0) +
         jnp.take(params["pos_emb"], positions, axis=0)).astype(jnp.float32)
    x = ln(x, params["emb_ln_g"], params["emb_ln_b"]) * maskf[..., None]
    attn_bias = ((1.0 - maskf) * NEG_INF)[:, None, None, :]

    for li in range(NUM_LAYERS):
        h = ln(x, params["ln1_g"][li], params["ln1_b"][li])
        qkv = mm(h, params["wqkv"][li]) + params["bqkv"][li]
        q, k, v = qkv[..., :D], qkv[..., D:2 * D], qkv[..., 2 * D:]

        def split(t):
            return t.reshape(B, L, NUM_HEADS, HEAD_DIM).transpose(0, 2, 1, 3)

        qh, kh, vh = split(q), split(k), split(v)
        # 1/sqrt(head_dim) is folded into wqkv/bqkv at init time.
        s = jnp.einsum("bhqd,bhkd->bhqk",
                       qh.astype(jnp.bfloat16), kh.astype(jnp.bfloat16),
                       preferred_element_type=jnp.float32)
        s = s + attn_bias
        s = s - jnp.max(s, axis=-1, keepdims=True)
        p = jnp.exp(s)
        p = p / jnp.sum(p, axis=-1, keepdims=True)
        a = jnp.einsum("bhqk,bhkd->bhqd",
                       p.astype(jnp.bfloat16), vh.astype(jnp.bfloat16),
                       preferred_element_type=jnp.float32)
        a = a.transpose(0, 2, 1, 3).reshape(B, L, D)
        x = x + mm(a, params["wo"][li]) + params["bo"][li]

        h = ln(x, params["ln2_g"][li], params["ln2_b"][li])
        f = jax.nn.gelu(mm(h, params["w1"][li]) + params["b1"][li],
                        approximate=True)
        x = x + mm(f, params["w2"][li]) + params["b2"][li]

    seq = ln(x, params["final_ln_g"], params["final_ln_b"])

    # direct transcription of PairwiseContactPredictionHead (incl. diff term)
    prod = seq[:, :, None, :] * seq[:, None, :, :]
    diff = seq[:, :, None, :] - seq[:, None, :, :]
    feat = jnp.concatenate([prod, diff], axis=-1)                 # (B, L, L, 2D)
    W = jnp.concatenate([params["contact_wpT"].T, params["contact_wdT"].T], axis=0)
    pred = feat @ W + params["contact_b"][0]                      # (B, L, L, 2)
    pred = 0.5 * (pred + pred.transpose(0, 2, 1, 3))
    return pred[:, 1:-1, 1:-1, :]


# ============================ main ============================

if __name__ == "__main__":
    key = jax.random.PRNGKey(0)
    pkey, tkey = jax.random.split(key)
    params = init_params(pkey)

    B, L = 2, 8
    protein_length = jnp.array([8, 6], dtype=jnp.int32)   # includes cls/eos
    residues = jax.random.randint(tkey, (B, L), 4, VOCAB, dtype=jnp.int32)
    pos = jnp.arange(L, dtype=jnp.int32)[None, :]
    len_col = protein_length[:, None]
    input_ids = jnp.where(
        pos == 0, CLS_IDX,
        jnp.where(pos == len_col - 1, EOS_IDX,
                  jnp.where(pos < len_col - 1, residues, PAD_IDX))).astype(jnp.int32)

    pred = protein_bert_contact_forward(params, input_ids, protein_length)
    pred = jax.block_until_ready(pred)

    ref = reference_forward(params, input_ids, protein_length)
    assert pred.shape == (B, L - 2, L - 2, 2), pred.shape
    assert np.all(np.isfinite(np.asarray(pred)))
    # bf16 matmuls in the kernels vs f32 feature math in the reference contact
    # head -> compare at 1e-2.
    assert np.allclose(np.asarray(pred), np.asarray(ref), atol=1e-2, rtol=1e-2), \
        "Pallas output does not match pure-JAX reference"
    # output must be symmetric in (i, j)
    assert np.allclose(np.asarray(pred), np.asarray(pred).transpose(0, 2, 1, 3),
                       atol=1e-6)
    print("KERNEL_OK")
</pallas_src>

<mosaic_0001>
module attributes {stable_mosaic.version = 11 : i64} {
  func.func @_encoder_kernel(%arg0: i32, %arg1: i32, %arg2: memref<1x8x32xf32, #tpu.memory_space<vmem>>, %arg3: memref<1x8x1xf32, #tpu.memory_space<vmem>>, %arg4: memref<1x1x8xf32, #tpu.memory_space<vmem>>, %arg5: memref<1x32xf32, #tpu.memory_space<vmem>>, %arg6: memref<1x32xf32, #tpu.memory_space<vmem>>, %arg7: memref<1x1x32xf32, #tpu.memory_space<vmem>>, %arg8: memref<1x1x32xf32, #tpu.memory_space<vmem>>, %arg9: memref<1x32x96xbf16, #tpu.memory_space<vmem>>, %arg10: memref<1x1x96xf32, #tpu.memory_space<vmem>>, %arg11: memref<1x32x32xbf16, #tpu.memory_space<vmem>>, %arg12: memref<1x1x32xf32, #tpu.memory_space<vmem>>, %arg13: memref<1x1x32xf32, #tpu.memory_space<vmem>>, %arg14: memref<1x1x32xf32, #tpu.memory_space<vmem>>, %arg15: memref<1x32x64xbf16, #tpu.memory_space<vmem>>, %arg16: memref<1x1x64xf32, #tpu.memory_space<vmem>>, %arg17: memref<1x64x32xbf16, #tpu.memory_space<vmem>>, %arg18: memref<1x1x32xf32, #tpu.memory_space<vmem>>, %arg19: memref<1x8x32xf32, #tpu.memory_space<vmem>>) attributes {dimension_semantics = [#tpu.dimension_semantics<parallel>, #tpu.dimension_semantics<arbitrary>], iteration_bounds = array<i64: 2, 2>, scalar_prefetch = 0 : i64, scratch_operands = 0 : i64, tpu.core_type = #tpu.core_type<tc>, window_params = [{transform_indices = @transform_0, window_bounds = array<i64: 1, 8, 32>}, {transform_indices = @transform_1, window_bounds = array<i64: 1, 8, 1>}, {transform_indices = @transform_2, window_bounds = array<i64: 1, 1, 8>}, {pipeline_mode = #tpu.pipeline_mode<synchronous>, transform_indices = @transform_3, window_bounds = array<i64: 1, 32>}, {pipeline_mode = #tpu.pipeline_mode<synchronous>, transform_indices = @transform_4, window_bounds = array<i64: 1, 32>}, {transform_indices = @transform_5, window_bounds = array<i64: 1, 1, 32>}, {transform_indices = @transform_6, window_bounds = array<i64: 1, 1, 32>}, {transform_indices = @transform_7, window_bounds = array<i64: 1, 32, 96>}, {transform_indices = @transform_8, window_bounds = array<i64: 1, 1, 96>}, {transform_indices = @transform_9, window_bounds = array<i64: 1, 32, 32>}, {transform_indices = @transform_10, window_bounds = array<i64: 1, 1, 32>}, {transform_indices = @transform_11, window_bounds = array<i64: 1, 1, 32>}, {transform_indices = @transform_12, window_bounds = array<i64: 1, 1, 32>}, {transform_indices = @transform_13, window_bounds = array<i64: 1, 32, 64>}, {transform_indices = @transform_14, window_bounds = array<i64: 1, 1, 64>}, {transform_indices = @transform_15, window_bounds = array<i64: 1, 64, 32>}, {transform_indices = @transform_16, window_bounds = array<i64: 1, 1, 32>}, {transform_indices = @transform_17, window_bounds = array<i64: 1, 8, 32>}]} {
    %c0_i32 = arith.constant 0 : i32
    %0 = arith.cmpi eq, %arg1, %c0_i32 : i32
    %1 = arith.extui %0 : i1 to i32
    %c0_i32_0 = arith.constant 0 : i32
    %2 = arith.cmpi ne, %1, %c0_i32_0 : i32
    scf.if %2 {
      %c0_81 = arith.constant 0 : index
      %c0_82 = arith.constant 0 : index
      %c0_83 = arith.constant 0 : index
      %205 = vector.load %arg2[%c0_81, %c0_82, %c0_83] : memref<1x8x32xf32, #tpu.memory_space<vmem>>, vector<1x8x32xf32>
      %206 = vector.shape_cast %205 : vector<1x8x32xf32> to vector<8x32xf32>
      %c0_84 = arith.constant 0 : index
      %c0_85 = arith.constant 0 : index
      %207 = vector.load %arg5[%c0_84, %c0_85] : memref<1x32xf32, #tpu.memory_space<vmem>>, vector<1x32xf32>
      %c0_86 = arith.constant 0 : index
      %c0_87 = arith.constant 0 : index
      %208 = vector.load %arg6[%c0_86, %c0_87] : memref<1x32xf32, #tpu.memory_space<vmem>>, vector<1x32xf32>
      %cst_88 = arith.constant dense<0.000000e+00> : vector<8xf32>
      %209 = vector.multi_reduction <add>, %206, %cst_88 [1] : vector<8x32xf32> to vector<8xf32>
      %210 = vector.shape_cast %209 : vector<8xf32> to vector<8x1xf32>
      %cst_89 = arith.constant 3.200000e+01 : f32
      %211 = vector.broadcast %cst_89 : f32 to vector<8x1xf32>
      %212 = arith.divf %210, %211 : vector<8x1xf32>
      %213 = vector.broadcast %212 : vector<8x1xf32> to vector<8x32xf32>
      %214 = arith.subf %206, %213 : vector<8x32xf32>
      %215 = arith.mulf %214, %214 : vector<8x32xf32>
      %cst_90 = arith.constant dense<0.000000e+00> : vector<8xf32>
      %216 = vector.multi_reduction <add>, %215, %cst_90 [1] : vector<8x32xf32> to vector<8xf32>
      %217 = vector.shape_cast %216 : vector<8xf32> to vector<8x1xf32>
      %cst_91 = arith.constant 3.200000e+01 : f32
      %218 = vector.broadcast %cst_91 : f32 to vector<8x1xf32>
      %219 = arith.divf %217, %218 : vector<8x1xf32>
      %cst_92 = arith.constant 9.99999974E-6 : f32
      %220 = vector.broadcast %cst_92 : f32 to vector<8x1xf32>
      %221 = arith.addf %219, %220 : vector<8x1xf32>
      %222 = math.rsqrt %221 : vector<8x1xf32>
      %223 = vector.broadcast %222 : vector<8x1xf32> to vector<8x32xf32>
      %224 = arith.mulf %214, %223 : vector<8x32xf32>
      %225 = vector.broadcast %207 : vector<1x32xf32> to vector<8x32xf32>
      %226 = arith.mulf %224, %225 : vector<8x32xf32>
      %227 = vector.broadcast %208 : vector<1x32xf32> to vector<8x32xf32>
      %228 = arith.addf %226, %227 : vector<8x32xf32>
      %c0_93 = arith.constant 0 : index
      %c0_94 = arith.constant 0 : index
      %c0_95 = arith.constant 0 : index
      %229 = vector.load %arg3[%c0_93, %c0_94, %c0_95] : memref<1x8x1xf32, #tpu.memory_space<vmem>>, vector<1x8x1xf32>
      %230 = vector.shape_cast %229 : vector<1x8x1xf32> to vector<8x1xf32>
      %231 = vector.broadcast %230 : vector<8x1xf32> to vector<8x32xf32>
      %232 = arith.mulf %228, %231 : vector<8x32xf32>
      %c0_96 = arith.constant 0 : index
      %c0_97 = arith.constant 0 : index
      %c0_98 = arith.constant 0 : index
      %233 = vector.load %arg19[%c0_96, %c0_97, %c0_98] : memref<1x8x32xf32, #tpu.memory_space<vmem>>, vector<1x8x32xf32>
      %234 = vector.shape_cast %233 : vector<1x8x32xf32> to vector<8x32xf32>
      %235 = vector.shape_cast %232 : vector<8x32xf32> to vector<1x8x32xf32>
      tpu.vector_store %arg19[%c0_96, %c0_97, %c0_98], %235 {strides = array<i32>} : memref<1x8x32xf32, #tpu.memory_space<vmem>>, vector<1x8x32xf32>,
    } else {
    }
    %c0 = arith.constant 0 : index
    %c0_1 = arith.constant 0 : index
    %c0_2 = arith.constant 0 : index
    %3 = vector.load %arg19[%c0, %c0_1, %c0_2] : memref<1x8x32xf32, #tpu.memory_space<vmem>>, vector<1x8x32xf32>
    %4 = vector.shape_cast %3 : vector<1x8x32xf32> to vector<8x32xf32>
    %c0_3 = arith.constant 0 : index
    %c0_4 = arith.constant 0 : index
    %c0_5 = arith.constant 0 : index
    %5 = vector.load %arg4[%c0_3, %c0_4, %c0_5] : memref<1x1x8xf32, #tpu.memory_space<vmem>>, vector<1x1x8xf32>
    %6 = vector.shape_cast %5 : vector<1x1x8xf32> to vector<1x8xf32>
    %c0_6 = arith.constant 0 : index
    %c0_7 = arith.constant 0 : index
    %c0_8 = arith.constant 0 : index
    %7 = vector.load %arg7[%c0_6, %c0_7, %c0_8] : memref<1x1x32xf32, #tpu.memory_space<vmem>>, vector<1x1x32xf32>
    %8 = vector.shape_cast %7 : vector<1x1x32xf32> to vector<1x32xf32>
    %c0_9 = arith.constant 0 : index
    %c0_10 = arith.constant 0 : index
    %c0_11 = arith.constant 0 : index
    %9 = vector.load %arg8[%c0_9, %c0_10, %c0_11] : memref<1x1x32xf32, #tpu.memory_space<vmem>>, vector<1x1x32xf32>
    %10 = vector.shape_cast %9 : vector<1x1x32xf32> to vector<1x32xf32>
    %cst = arith.constant dense<0.000000e+00> : vector<8xf32>
    %11 = vector.multi_reduction <add>, %4, %cst [1] : vector<8x32xf32> to vector<8xf32>
    %12 = vector.shape_cast %11 : vector<8xf32> to vector<8x1xf32>
    %cst_12 = arith.constant 3.200000e+01 : f32
    %13 = vector.broadcast %cst_12 : f32 to vector<8x1xf32>
    %14 = arith.divf %12, %13 : vector<8x1xf32>
    %15 = vector.broadcast %14 : vector<8x1xf32> to vector<8x32xf32>
    %16 = arith.subf %4, %15 : vector<8x32xf32>
    %17 = arith.mulf %16, %16 : vector<8x32xf32>
    %cst_13 = arith.constant dense<0.000000e+00> : vector<8xf32>
    %18 = vector.multi_reduction <add>, %17, %cst_13 [1] : vector<8x32xf32> to vector<8xf32>
    %19 = vector.shape_cast %18 : vector<8xf32> to vector<8x1xf32>
    %cst_14 = arith.constant 3.200000e+01 : f32
    %20 = vector.broadcast %cst_14 : f32 to vector<8x1xf32>
    %21 = arith.divf %19, %20 : vector<8x1xf32>
    %cst_15 = arith.constant 9.99999974E-6 : f32
    %22 = vector.broadcast %cst_15 : f32 to vector<8x1xf32>
    %23 = arith.addf %21, %22 : vector<8x1xf32>
    %24 = math.rsqrt %23 : vector<8x1xf32>
    %25 = vector.broadcast %24 : vector<8x1xf32> to vector<8x32xf32>
    %26 = arith.mulf %16, %25 : vector<8x32xf32>
    %27 = vector.broadcast %8 : vector<1x32xf32> to vector<8x32xf32>
    %28 = arith.mulf %26, %27 : vector<8x32xf32>
    %29 = vector.broadcast %10 : vector<1x32xf32> to vector<8x32xf32>
    %30 = arith.addf %28, %29 : vector<8x32xf32>
    %31 = arith.truncf %30 : vector<8x32xf32> to vector<8x32xbf16>
    %c0_16 = arith.constant 0 : index
    %c0_17 = arith.constant 0 : index
    %c0_18 = arith.constant 0 : index
    %32 = vector.load %arg9[%c0_16, %c0_17, %c0_18] : memref<1x32x96xbf16, #tpu.memory_space<vmem>>, vector<1x32x96xbf16>
    %33 = vector.shape_cast %32 : vector<1x32x96xbf16> to vector<32x96xbf16>
    %cst_19 = arith.constant dense<0.000000e+00> : vector<8x96xf32>
    %34 = tpu.matmul %31, %33, %cst_19 {dimension_numbers = #tpu.dot_dimension_numbers<[1], [0], [0], [1], [0, 0, 1, 1], [], []>} : vector<8x32xbf16>, vector<32x96xbf16>, vector<8x96xf32> -> vector<8x96xf32>
    %c0_20 = arith.constant 0 : index
    %c0_21 = arith.constant 0 : index
    %c0_22 = arith.constant 0 : index
    %35 = vector.load %arg10[%c0_20, %c0_21, %c0_22] : memref<1x1x96xf32, #tpu.memory_space<vmem>>, vector<1x1x96xf32>
    %36 = vector.shape_cast %35 : vector<1x1x96xf32> to vector<1x96xf32>
    %37 = vector.broadcast %36 : vector<1x96xf32> to vector<8x96xf32>
    %38 = arith.addf %34, %37 : vector<8x96xf32>
    %39 = vector.extract_strided_slice %38 {offsets = [0, 0], sizes = [8, 32], strides = [1, 1]} : vector<8x96xf32> to vector<8x32xf32>
    %40 = vector.extract_strided_slice %38 {offsets = [0, 32], sizes = [8, 32], strides = [1, 1]} : vector<8x96xf32> to vector<8x32xf32>
    %41 = vector.extract_strided_slice %38 {offsets = [0, 64], sizes = [8, 32], strides = [1, 1]} : vector<8x96xf32> to vector<8x32xf32>
    %c0_23 = arith.constant 0 : index
    %c0_24 = arith.constant 0 : index
    %c0_25 = arith.constant 0 : index
    %42 = vector.load %arg11[%c0_23, %c0_24, %c0_25] : memref<1x32x32xbf16, #tpu.memory_space<vmem>>, vector<1x32x32xbf16>
    %43 = vector.shape_cast %42 : vector<1x32x32xbf16> to vector<32x32xbf16>
    %44 = vector.extract_strided_slice %39 {offsets = [0, 0], sizes = [8, 8], strides = [1, 1]} : vector<8x32xf32> to vector<8x8xf32>
    %45 = arith.truncf %44 : vector<8x8xf32> to vector<8x8xbf16>
    %46 = vector.extract_strided_slice %40 {offsets = [0, 0], sizes = [8, 8], strides = [1, 1]} : vector<8x32xf32> to vector<8x8xf32>
    %47 = arith.truncf %46 : vector<8x8xf32> to vector<8x8xbf16>
    %48 = vector.extract_strided_slice %41 {offsets = [0, 0], sizes = [8, 8], strides = [1, 1]} : vector<8x32xf32> to vector<8x8xf32>
    %49 = arith.truncf %48 : vector<8x8xf32> to vector<8x8xbf16>
    %cst_26 = arith.constant dense<0.000000e+00> : vector<8x8xf32>
    %50 = tpu.matmul %45, %47, %cst_26 {dimension_numbers = #tpu.dot_dimension_numbers<[1], [1], [0], [0], [0, 0, 1, 0], [], []>} : vector<8x8xbf16>, vector<8x8xbf16>, vector<8x8xf32> -> vector<8x8xf32>
    %51 = vector.broadcast %6 : vector<1x8xf32> to vector<8x8xf32>
    %52 = arith.addf %50, %51 : vector<8x8xf32>
    %cst_27 = arith.constant dense<0xFF800000> : vector<8xf32>
    %53 = vector.multi_reduction <maximumf>, %52, %cst_27 [1] : vector<8x8xf32> to vector<8xf32>
    %54 = vector.shape_cast %53 : vector<8xf32> to vector<8x1xf32>
    %55 = vector.broadcast %54 : vector<8x1xf32> to vector<8x8xf32>
    %56 = arith.subf %52, %55 : vector<8x8xf32>
    %57 = math.exp %56 : vector<8x8xf32>
    %cst_28 = arith.constant dense<0.000000e+00> : vector<8xf32>
    %58 = vector.multi_reduction <add>, %57, %cst_28 [1] : vector<8x8xf32> to vector<8xf32>
    %59 = vector.shape_cast %58 : vector<8xf32> to vector<8x1xf32>
    %60 = tpu.reciprocal %59 : vector<8x1xf32> -> vector<8x1xf32>
    %61 = vector.broadcast %60 : vector<8x1xf32> to vector<8x8xf32>
    %62 = arith.mulf %57, %61 : vector<8x8xf32>
    %63 = arith.truncf %62 : vector<8x8xf32> to vector<8x8xbf16>
    %cst_29 = arith.constant dense<0.000000e+00> : vector<8x8xf32>
    %64 = tpu.matmul %63, %49, %cst_29 {dimension_numbers = #tpu.dot_dimension_numbers<[1], [0], [0], [1], [0, 0, 1, 1], [], []>} : vector<8x8xbf16>, vector<8x8xbf16>, vector<8x8xf32> -> vector<8x8xf32>
    %65 = arith.truncf %64 : vector<8x8xf32> to vector<8x8xbf16>
    %66 = vector.extract_strided_slice %43 {offsets = [0, 0], sizes = [8, 32], strides = [1, 1]} : vector<32x32xbf16> to vector<8x32xbf16>
    %cst_30 = arith.constant dense<0.000000e+00> : vector<8x32xf32>
    %67 = tpu.matmul %65, %66, %cst_30 {dimension_numbers = #tpu.dot_dimension_numbers<[1], [0], [0], [1], [0, 0, 1, 1], [], []>} : vector<8x8xbf16>, vector<8x32xbf16>, vector<8x32xf32> -> vector<8x32xf32>
    %68 = vector.extract_strided_slice %39 {offsets = [0, 8], sizes = [8, 8], strides = [1, 1]} : vector<8x32xf32> to vector<8x8xf32>
    %69 = arith.truncf %68 : vector<8x8xf32> to vector<8x8xbf16>
    %70 = vector.extract_strided_slice %40 {offsets = [0, 8], sizes = [8, 8], strides = [1, 1]} : vector<8x32xf32> to vector<8x8xf32>
    %71 = arith.truncf %70 : vector<8x8xf32> to vector<8x8xbf16>
    %72 = vector.extract_strided_slice %41 {offsets = [0, 8], sizes = [8, 8], strides = [1, 1]} : vector<8x32xf32> to vector<8x8xf32>
    %73 = arith.truncf %72 : vector<8x8xf32> to vector<8x8xbf16>
    %cst_31 = arith.constant dense<0.000000e+00> : vector<8x8xf32>
    %74 = tpu.matmul %69, %71, %cst_31 {dimension_numbers = #tpu.dot_dimension_numbers<[1], [1], [0], [0], [0, 0, 1, 0], [], []>} : vector<8x8xbf16>, vector<8x8xbf16>, vector<8x8xf32> -> vector<8x8xf32>
    %75 = vector.broadcast %6 : vector<1x8xf32> to vector<8x8xf32>
    %76 = arith.addf %74, %75 : vector<8x8xf32>
    %cst_32 = arith.constant dense<0xFF800000> : vector<8xf32>
    %77 = vector.multi_reduction <maximumf>, %76, %cst_32 [1] : vector<8x8xf32> to vector<8xf32>
    %78 = vector.shape_cast %77 : vector<8xf32> to vector<8x1xf32>
    %79 = vector.broadcast %78 : vector<8x1xf32> to vector<8x8xf32>
    %80 = arith.subf %76, %79 : vector<8x8xf32>
    %81 = math.exp %80 : vector<8x8xf32>
    %cst_33 = arith.constant dense<0.000000e+00> : vector<8xf32>
    %82 = vector.multi_reduction <add>, %81, %cst_33 [1] : vector<8x8xf32> to vector<8xf32>
    %83 = vector.shape_cast %82 : vector<8xf32> to vector<8x1xf32>
    %84 = tpu.reciprocal %83 : vector<8x1xf32> -> vector<8x1xf32>
    %85 = vector.broadcast %84 : vector<8x1xf32> to vector<8x8xf32>
    %86 = arith.mulf %81, %85 : vector<8x8xf32>
    %87 = arith.truncf %86 : vector<8x8xf32> to vector<8x8xbf16>
    %cst_34 = arith.constant dense<0.000000e+00> : vector<8x8xf32>
    %88 = tpu.matmul %87, %73, %cst_34 {dimension_numbers = #tpu.dot_dimension_numbers<[1], [0], [0], [1], [0, 0, 1, 1], [], []>} : vector<8x8xbf16>, vector<8x8xbf16>, vector<8x8xf32> -> vector<8x8xf32>
    %89 = arith.truncf %88 : vector<8x8xf32> to vector<8x8xbf16>
    %90 = vector.extract_strided_slice %43 {offsets = [8, 0], sizes = [8, 32], strides = [1, 1]} : vector<32x32xbf16> to vector<8x32xbf16>
    %cst_35 = arith.constant dense<0.000000e+00> : vector<8x32xf32>
    %91 = tpu.matmul %89, %90, %cst_35 {dimension_numbers = #tpu.dot_dimension_numbers<[1], [0], [0], [1], [0, 0, 1, 1], [], []>} : vector<8x8xbf16>, vector<8x32xbf16>, vector<8x32xf32> -> vector<8x32xf32>
    %92 = arith.addf %67, %91 : vector<8x32xf32>
    %93 = vector.extract_strided_slice %39 {offsets = [0, 16], sizes = [8, 8], strides = [1, 1]} : vector<8x32xf32> to vector<8x8xf32>
    %94 = arith.truncf %93 : vector<8x8xf32> to vector<8x8xbf16>
    %95 = vector.extract_strided_slice %40 {offsets = [0, 16], sizes = [8, 8], strides = [1, 1]} : vector<8x32xf32> to vector<8x8xf32>
    %96 = arith.truncf %95 : vector<8x8xf32> to vector<8x8xbf16>
    %97 = vector.extract_strided_slice %41 {offsets = [0, 16], sizes = [8, 8], strides = [1, 1]} : vector<8x32xf32> to vector<8x8xf32>
    %98 = arith.truncf %97 : vector<8x8xf32> to vector<8x8xbf16>
    %cst_36 = arith.constant dense<0.000000e+00> : vector<8x8xf32>
    %99 = tpu.matmul %94, %96, %cst_36 {dimension_numbers = #tpu.dot_dimension_numbers<[1], [1], [0], [0], [0, 0, 1, 0], [], []>} : vector<8x8xbf16>, vector<8x8xbf16>, vector<8x8xf32> -> vector<8x8xf32>
    %100 = vector.broadcast %6 : vector<1x8xf32> to vector<8x8xf32>
    %101 = arith.addf %99, %100 : vector<8x8xf32>
    %cst_37 = arith.constant dense<0xFF800000> : vector<8xf32>
    %102 = vector.multi_reduction <maximumf>, %101, %cst_37 [1] : vector<8x8xf32> to vector<8xf32>
    %103 = vector.shape_cast %102 : vector<8xf32> to vector<8x1xf32>
    %104 = vector.broadcast %103 : vector<8x1xf32> to vector<8x8xf32>
    %105 = arith.subf %101, %104 : vector<8x8xf32>
    %106 = math.exp %105 : vector<8x8xf32>
    %cst_38 = arith.constant dense<0.000000e+00> : vector<8xf32>
    %107 = vector.multi_reduction <add>, %106, %cst_38 [1] : vector<8x8xf32> to vector<8xf32>
    %108 = vector.shape_cast %107 : vector<8xf32> to vector<8x1xf32>
    %109 = tpu.reciprocal %108 : vector<8x1xf32> -> vector<8x1xf32>
    %110 = vector.broadcast %109 : vector<8x1xf32> to vector<8x8xf32>
    %111 = arith.mulf %106, %110 : vector<8x8xf32>
    %112 = arith.truncf %111 : vector<8x8xf32> to vector<8x8xbf16>
    %cst_39 = arith.constant dense<0.000000e+00> : vector<8x8xf32>
    %113 = tpu.matmul %112, %98, %cst_39 {dimension_numbers = #tpu.dot_dimension_numbers<[1], [0], [0], [1], [0, 0, 1, 1], [], []>} : vector<8x8xbf16>, vector<8x8xbf16>, vector<8x8xf32> -> vector<8x8xf32>
    %114 = arith.truncf %113 : vector<8x8xf32> to vector<8x8xbf16>
    %115 = vector.extract_strided_slice %43 {offsets = [16, 0], sizes = [8, 32], strides = [1, 1]} : vector<32x32xbf16> to vector<8x32xbf16>
    %cst_40 = arith.constant dense<0.000000e+00> : vector<8x32xf32>
    %116 = tpu.matmul %114, %115, %cst_40 {dimension_numbers = #tpu.dot_dimension_numbers<[1], [0], [0], [1], [0, 0, 1, 1], [], []>} : vector<8x8xbf16>, vector<8x32xbf16>, vector<8x32xf32> -> vector<8x32xf32>
    %117 = arith.addf %92, %116 : vector<8x32xf32>
    %118 = vector.extract_strided_slice %39 {offsets = [0, 24], sizes = [8, 8], strides = [1, 1]} : vector<8x32xf32> to vector<8x8xf32>
    %119 = arith.truncf %118 : vector<8x8xf32> to vector<8x8xbf16>
    %120 = vector.extract_strided_slice %40 {offsets = [0, 24], sizes = [8, 8], strides = [1, 1]} : vector<8x32xf32> to vector<8x8xf32>
    %121 = arith.truncf %120 : vector<8x8xf32> to vector<8x8xbf16>
    %122 = vector.extract_strided_slice %41 {offsets = [0, 24], sizes = [8, 8], strides = [1, 1]} : vector<8x32xf32> to vector<8x8xf32>
    %123 = arith.truncf %122 : vector<8x8xf32> to vector<8x8xbf16>
    %cst_41 = arith.constant dense<0.000000e+00> : vector<8x8xf32>
    %124 = tpu.matmul %119, %121, %cst_41 {dimension_numbers = #tpu.dot_dimension_numbers<[1], [1], [0], [0], [0, 0, 1, 0], [], []>} : vector<8x8xbf16>, vector<8x8xbf16>, vector<8x8xf32> -> vector<8x8xf32>
    %125 = vector.broadcast %6 : vector<1x8xf32> to vector<8x8xf32>
    %126 = arith.addf %124, %125 : vector<8x8xf32>
    %cst_42 = arith.constant dense<0xFF800000> : vector<8xf32>
    %127 = vector.multi_reduction <maximumf>, %126, %cst_42 [1] : vector<8x8xf32> to vector<8xf32>
    %128 = vector.shape_cast %127 : vector<8xf32> to vector<8x1xf32>
    %129 = vector.broadcast %128 : vector<8x1xf32> to vector<8x8xf32>
    %130 = arith.subf %126, %129 : vector<8x8xf32>
    %131 = math.exp %130 : vector<8x8xf32>
    %cst_43 = arith.constant dense<0.000000e+00> : vector<8xf32>
    %132 = vector.multi_reduction <add>, %131, %cst_43 [1] : vector<8x8xf32> to vector<8xf32>
    %133 = vector.shape_cast %132 : vector<8xf32> to vector<8x1xf32>
    %134 = tpu.reciprocal %133 : vector<8x1xf32> -> vector<8x1xf32>
    %135 = vector.broadcast %134 : vector<8x1xf32> to vector<8x8xf32>
    %136 = arith.mulf %131, %135 : vector<8x8xf32>
    %137 = arith.truncf %136 : vector<8x8xf32> to vector<8x8xbf16>
    %cst_44 = arith.constant dense<0.000000e+00> : vector<8x8xf32>
    %138 = tpu.matmul %137, %123, %cst_44 {dimension_numbers = #tpu.dot_dimension_numbers<[1], [0], [0], [1], [0, 0, 1, 1], [], []>} : vector<8x8xbf16>, vector<8x8xbf16>, vector<8x8xf32> -> vector<8x8xf32>
    %139 = arith.truncf %138 : vector<8x8xf32> to vector<8x8xbf16>
    %140 = vector.extract_strided_slice %43 {offsets = [24, 0], sizes = [8, 32], strides = [1, 1]} : vector<32x32xbf16> to vector<8x32xbf16>
    %cst_45 = arith.constant dense<0.000000e+00> : vector<8x32xf32>
    %141 = tpu.matmul %139, %140, %cst_45 {dimension_numbers = #tpu.dot_dimension_numbers<[1], [0], [0], [1], [0, 0, 1, 1], [], []>} : vector<8x8xbf16>, vector<8x32xbf16>, vector<8x32xf32> -> vector<8x32xf32>
    %142 = arith.addf %117, %141 : vector<8x32xf32>
    %143 = arith.addf %4, %142 : vector<8x32xf32>
    %c0_46 = arith.constant 0 : index
    %c0_47 = arith.constant 0 : index
    %c0_48 = arith.constant 0 : index
    %144 = vector.load %arg12[%c0_46, %c0_47, %c0_48] : memref<1x1x32xf32, #tpu.memory_space<vmem>>, vector<1x1x32xf32>
    %145 = vector.shape_cast %144 : vector<1x1x32xf32> to vector<1x32xf32>
    %146 = vector.broadcast %145 : vector<1x32xf32> to vector<8x32xf32>
    %147 = arith.addf %143, %146 : vector<8x32xf32>
    %c0_49 = arith.constant 0 : index
    %c0_50 = arith.constant 0 : index
    %c0_51 = arith.constant 0 : index
    %148 = vector.load %arg13[%c0_49, %c0_50, %c0_51] : memref<1x1x32xf32, #tpu.memory_space<vmem>>, vector<1x1x32xf32>
    %149 = vector.shape_cast %148 : vector<1x1x32xf32> to vector<1x32xf32>
    %c0_52 = arith.constant 0 : index
    %c0_53 = arith.constant 0 : index
    %c0_54 = arith.constant 0 : index
    %150 = vector.load %arg14[%c0_52, %c0_53, %c0_54] : memref<1x1x32xf32, #tpu.memory_space<vmem>>, vector<1x1x32xf32>
    %151 = vector.shape_cast %150 : vector<1x1x32xf32> to vector<1x32xf32>
    %cst_55 = arith.constant dense<0.000000e+00> : vector<8xf32>
    %152 = vector.multi_reduction <add>, %147, %cst_55 [1] : vector<8x32xf32> to vector<8xf32>
    %153 = vector.shape_cast %152 : vector<8xf32> to vector<8x1xf32>
    %cst_56 = arith.constant 3.200000e+01 : f32
    %154 = vector.broadcast %cst_56 : f32 to vector<8x1xf32>
    %155 = arith.divf %153, %154 : vector<8x1xf32>
    %156 = vector.broadcast %155 : vector<8x1xf32> to vector<8x32xf32>
    %157 = arith.subf %147, %156 : vector<8x32xf32>
    %158 = arith.mulf %157, %157 : vector<8x32xf32>
    %cst_57 = arith.constant dense<0.000000e+00> : vector<8xf32>
    %159 = vector.multi_reduction <add>, %158, %cst_57 [1] : vector<8x32xf32> to vector<8xf32>
    %160 = vector.shape_cast %159 : vector<8xf32> to vector<8x1xf32>
    %cst_58 = arith.constant 3.200000e+01 : f32
    %161 = vector.broadcast %cst_58 : f32 to vector<8x1xf32>
    %162 = arith.divf %160, %161 : vector<8x1xf32>
    %cst_59 = arith.constant 9.99999974E-6 : f32
    %163 = vector.broadcast %cst_59 : f32 to vector<8x1xf32>
    %164 = arith.addf %162, %163 : vector<8x1xf32>
    %165 = math.rsqrt %164 : vector<8x1xf32>
    %166 = vector.broadcast %165 : vector<8x1xf32> to vector<8x32xf32>
    %167 = arith.mulf %157, %166 : vector<8x32xf32>
    %168 = vector.broadcast %149 : vector<1x32xf32> to vector<8x32xf32>
    %169 = arith.mulf %167, %168 : vector<8x32xf32>
    %170 = vector.broadcast %151 : vector<1x32xf32> to vector<8x32xf32>
    %171 = arith.addf %169, %170 : vector<8x32xf32>
    %172 = arith.truncf %171 : vector<8x32xf32> to vector<8x32xbf16>
    %c0_60 = arith.constant 0 : index
    %c0_61 = arith.constant 0 : index
    %c0_62 = arith.constant 0 : index
    %173 = vector.load %arg15[%c0_60, %c0_61, %c0_62] : memref<1x32x64xbf16, #tpu.memory_space<vmem>>, vector<1x32x64xbf16>
    %174 = vector.shape_cast %173 : vector<1x32x64xbf16> to vector<32x64xbf16>
    %cst_63 = arith.constant dense<0.000000e+00> : vector<8x64xf32>
    %175 = tpu.matmul %172, %174, %cst_63 {dimension_numbers = #tpu.dot_dimension_numbers<[1], [0], [0], [1], [0, 0, 1, 1], [], []>} : vector<8x32xbf16>, vector<32x64xbf16>, vector<8x64xf32> -> vector<8x64xf32>
    %c0_64 = arith.constant 0 : index
    %c0_65 = arith.constant 0 : index
    %c0_66 = arith.constant 0 : index
    %176 = vector.load %arg16[%c0_64, %c0_65, %c0_66] : memref<1x1x64xf32, #tpu.memory_space<vmem>>, vector<1x1x64xf32>
    %177 = vector.shape_cast %176 : vector<1x1x64xf32> to vector<1x64xf32>
    %178 = vector.broadcast %177 : vector<1x64xf32> to vector<8x64xf32>
    %179 = arith.addf %175, %178 : vector<8x64xf32>
    %180 = arith.mulf %179, %179 : vector<8x64xf32>
    %181 = arith.mulf %179, %180 : vector<8x64xf32>
    %cst_67 = arith.constant 4.471500e-02 : f32
    %182 = vector.broadcast %cst_67 : f32 to vector<8x64xf32>
    %183 = arith.mulf %182, %181 : vector<8x64xf32>
    %184 = arith.addf %179, %183 : vector<8x64xf32>
    %cst_68 = arith.constant 0.797884583 : f32
    %185 = vector.broadcast %cst_68 : f32 to vector<8x64xf32>
    %186 = arith.mulf %185, %184 : vector<8x64xf32>
    %187 = math.tanh %186 : vector<8x64xf32>
    %cst_69 = arith.constant 1.000000e+00 : f32
    %188 = vector.broadcast %cst_69 : f32 to vector<8x64xf32>
    %189 = arith.addf %188, %187 : vector<8x64xf32>
    %cst_70 = arith.constant 5.000000e-01 : f32
    %190 = vector.broadcast %cst_70 : f32 to vector<8x64xf32>
    %191 = arith.mulf %190, %189 : vector<8x64xf32>
    %192 = arith.mulf %179, %191 : vector<8x64xf32>
    %193 = arith.truncf %192 : vector<8x64xf32> to vector<8x64xbf16>
    %c0_71 = arith.constant 0 : index
    %c0_72 = arith.constant 0 : index
    %c0_73 = arith.constant 0 : index
    %194 = vector.load %arg17[%c0_71, %c0_72, %c0_73] : memref<1x64x32xbf16, #tpu.memory_space<vmem>>, vector<1x64x32xbf16>
    %195 = vector.shape_cast %194 : vector<1x64x32xbf16> to vector<64x32xbf16>
    %cst_74 = arith.constant dense<0.000000e+00> : vector<8x32xf32>
    %196 = tpu.matmul %193, %195, %cst_74 {dimension_numbers = #tpu.dot_dimension_numbers<[1], [0], [0], [1], [0, 0, 1, 1], [], []>} : vector<8x64xbf16>, vector<64x32xbf16>, vector<8x32xf32> -> vector<8x32xf32>
    %197 = arith.addf %147, %196 : vector<8x32xf32>
    %c0_75 = arith.constant 0 : index
    %c0_76 = arith.constant 0 : index
    %c0_77 = arith.constant 0 : index
    %198 = vector.load %arg18[%c0_75, %c0_76, %c0_77] : memref<1x1x32xf32, #tpu.memory_space<vmem>>, vector<1x1x32xf32>
    %199 = vector.shape_cast %198 : vector<1x1x32xf32> to vector<1x32xf32>
    %200 = vector.broadcast %199 : vector<1x32xf32> to vector<8x32xf32>
    %201 = arith.addf %197, %200 : vector<8x32xf32>
    %c0_78 = arith.constant 0 : index
    %c0_79 = arith.constant 0 : index
    %c0_80 = arith.constant 0 : index
    %202 = vector.load %arg19[%c0_78, %c0_79, %c0_80] : memref<1x8x32xf32, #tpu.memory_space<vmem>>, vector<1x8x32xf32>
    %203 = vector.shape_cast %202 : vector<1x8x32xf32> to vector<8x32xf32>
    %204 = vector.shape_cast %201 : vector<8x32xf32> to vector<1x8x32xf32>
    tpu.vector_store %arg19[%c0_78, %c0_79, %c0_80], %204 {strides = array<i32>} : memref<1x8x32xf32, #tpu.memory_space<vmem>>, vector<1x8x32xf32>,
    return
  }
  func.func @transform_0(%arg0: i32, %arg1: i32) -> (i32, i32, i32) {
    %c0_i32 = arith.constant 0 : i32
    %c0_i32_0 = arith.constant 0 : i32
    %c0_i32_1 = arith.constant 0 : i32
    return %arg0, %c0_i32, %c0_i32_0 : i32, i32, i32
  }
  func.func @transform_1(%arg0: i32, %arg1: i32) -> (i32, i32, i32) {
    %c0_i32 = arith.constant 0 : i32
    %c0_i32_0 = arith.constant 0 : i32
    %c0_i32_1 = arith.constant 0 : i32
    return %arg0, %c0_i32, %c0_i32_0 : i32, i32, i32
  }
  func.func @transform_2(%arg0: i32, %arg1: i32) -> (i32, i32, i32) {
    %c0_i32 = arith.constant 0 : i32
    %c0_i32_0 = arith.constant 0 : i32
    %c0_i32_1 = arith.constant 0 : i32
    return %arg0, %c0_i32, %c0_i32_0 : i32, i32, i32
  }
  func.func @transform_3(%arg0: i32, %arg1: i32) -> (i32, i32) {
    %c0_i32 = arith.constant 0 : i32
    %c0_i32_0 = arith.constant 0 : i32
    %c0_i32_1 = arith.constant 0 : i32
    return %c0_i32, %c0_i32_0 : i32, i32
  }
  func.func @transform_4(%arg0: i32, %arg1: i32) -> (i32, i32) {
    %c0_i32 = arith.constant 0 : i32
    %c0_i32_0 = arith.constant 0 : i32
    %c0_i32_1 = arith.constant 0 : i32
    return %c0_i32, %c0_i32_0 : i32, i32
  }
  func.func @transform_5(%arg0: i32, %arg1: i32) -> (i32, i32, i32) {
    %c0_i32 = arith.constant 0 : i32
    %c0_i32_0 = arith.constant 0 : i32
    %c0_i32_1 = arith.constant 0 : i32
    return %arg1, %c0_i32, %c0_i32_0 : i32, i32, i32
  }
  func.func @transform_6(%arg0: i32, %arg1: i32) -> (i32, i32, i32) {
    %c0_i32 = arith.constant 0 : i32
    %c0_i32_0 = arith.constant 0 : i32
    %c0_i32_1 = arith.constant 0 : i32
    return %arg1, %c0_i32, %c0_i32_0 : i32, i32, i32
  }
  func.func @transform_7(%arg0: i32, %arg1: i32) -> (i32, i32, i32) {
    %c0_i32 = arith.constant 0 : i32
    %c0_i32_0 = arith.constant 0 : i32
    %c0_i32_1 = arith.constant 0 : i32
    return %arg1, %c0_i32, %c0_i32_0 : i32, i32, i32
  }
  func.func @transform_8(%arg0: i32, %arg1: i32) -> (i32, i32, i32) {
    %c0_i32 = arith.constant 0 : i32
    %c0_i32_0 = arith.constant 0 : i32
    %c0_i32_1 = arith.constant 0 : i32
    return %arg1, %c0_i32, %c0_i32_0 : i32, i32, i32
  }
  func.func @transform_9(%arg0: i32, %arg1: i32) -> (i32, i32, i32) {
    %c0_i32 = arith.constant 0 : i32
    %c0_i32_0 = arith.constant 0 : i32
    %c0_i32_1 = arith.constant 0 : i32
    return %arg1, %c0_i32, %c0_i32_0 : i32, i32, i32
  }
  func.func @transform_10(%arg0: i32, %arg1: i32) -> (i32, i32, i32) {
    %c0_i32 = arith.constant 0 : i32
    %c0_i32_0 = arith.constant 0 : i32
    %c0_i32_1 = arith.constant 0 : i32
    return %arg1, %c0_i32, %c0_i32_0 : i32, i32, i32
  }
  func.func @transform_11(%arg0: i32, %arg1: i32) -> (i32, i32, i32) {
    %c0_i32 = arith.constant 0 : i32
    %c0_i32_0 = arith.constant 0 : i32
    %c0_i32_1 = arith.constant 0 : i32
    return %arg1, %c0_i32, %c0_i32_0 : i32, i32, i32
  }
  func.func @transform_12(%arg0: i32, %arg1: i32) -> (i32, i32, i32) {
    %c0_i32 = arith.constant 0 : i32
    %c0_i32_0 = arith.constant 0 : i32
    %c0_i32_1 = arith.constant 0 : i32
    return %arg1, %c0_i32, %c0_i32_0 : i32, i32, i32
  }
  func.func @transform_13(%arg0: i32, %arg1: i32) -> (i32, i32, i32) {
    %c0_i32 = arith.constant 0 : i32
    %c0_i32_0 = arith.constant 0 : i32
    %c0_i32_1 = arith.constant 0 : i32
    return %arg1, %c0_i32, %c0_i32_0 : i32, i32, i32
  }
  func.func @transform_14(%arg0: i32, %arg1: i32) -> (i32, i32, i32) {
    %c0_i32 = arith.constant 0 : i32
    %c0_i32_0 = arith.constant 0 : i32
    %c0_i32_1 = arith.constant 0 : i32
    return %arg1, %c0_i32, %c0_i32_0 : i32, i32, i32
  }
  func.func @transform_15(%arg0: i32, %arg1: i32) -> (i32, i32, i32) {
    %c0_i32 = arith.constant 0 : i32
    %c0_i32_0 = arith.constant 0 : i32
    %c0_i32_1 = arith.constant 0 : i32
    return %arg1, %c0_i32, %c0_i32_0 : i32, i32, i32
  }
  func.func @transform_16(%arg0: i32, %arg1: i32) -> (i32, i32, i32) {
    %c0_i32 = arith.constant 0 : i32
    %c0_i32_0 = arith.constant 0 : i32
    %c0_i32_1 = arith.constant 0 : i32
    return %arg1, %c0_i32, %c0_i32_0 : i32, i32, i32
  }
  func.func @transform_17(%arg0: i32, %arg1: i32) -> (i32, i32, i32) {
    %c0_i32 = arith.constant 0 : i32
    %c0_i32_0 = arith.constant 0 : i32
    %c0_i32_1 = arith.constant 0 : i32
    return %arg0, %c0_i32, %c0_i32_0 : i32, i32, i32
  }
}

</mosaic_0001>

<bundles_post_ra>
// kernel: tpu_custom_call.1
= control target key start
LH: loop header
LB: loop body
LE: loop exit
PB: predicated region body
PF: predicated region fallthrough
CT: control target
= control target key end

     0   :  { %s3006_s0 = inlined_call_operand.vmem [shape: f32[2,8,32], index: 0, kind: input, shape index: {}]   ;;  %s3007_s1 = inlined_call_operand.vmem [shape: f32[2,8,1], index: 1, kind: input, shape index: {}]   ;;  %s3008_s2 = inlined_call_operand.vmem [shape: f32[2,1,8], index: 2, kind: input, shape index: {}]   ;;  %s3009_s3 = inlined_call_operand.vmem [shape: f32[1,32], index: 3, kind: input, shape index: {}]   ;;  %s3010_s4 = inlined_call_operand.hbm [shape: f32[1,32], index: 4, kind: input, shape index: {}]   ;;  %s3011_s5 = inlined_call_operand.vmem [shape: f32[2,1,32], index: 5, kind: input, shape index: {}]   ;;  %s3012_s6 = inlined_call_operand.vmem [shape: f32[2,1,32], index: 6, kind: input, shape index: {}]   ;;  %s3013_s7 = inlined_call_operand.vmem [shape: bf16[2,32,96], index: 7, kind: input, shape index: {}]   ;;  %s3014_s8 = inlined_call_operand.vmem [shape: f32[2,1,96], index: 8, kind: input, shape index: {}]   ;;  %s3015_s9 = inlined_call_operand.vmem [shape: bf16[2,32,32], index: 9, kind: input, shape index: {}]   ;;  %s3016_s10 = inlined_call_operand.vmem [shape: f32[2,1,32], index: 10, kind: input, shape index: {}]   ;;  %s3017_s11 = inlined_call_operand.vmem [shape: f32[2,1,32], index: 11, kind: input, shape index: {}]   ;;  %s3018_s12 = inlined_call_operand.vmem [shape: f32[2,1,32], index: 12, kind: input, shape index: {}]   ;;  %s3019_s13 = inlined_call_operand.vmem [shape: bf16[2,32,64], index: 13, kind: input, shape index: {}]   ;;  %s3020_s14 = inlined_call_operand.vmem [shape: f32[2,1,64], index: 14, kind: input, shape index: {}]   ;;  %s3021_s15 = inlined_call_operand.vmem [shape: bf16[2,64,32], index: 15, kind: input, shape index: {}]   ;;  %s3022_s16 = inlined_call_operand.vmem [shape: f32[2,1,32], index: 16, kind: input, shape index: {}]   ;;  %s3023_s17 = inlined_call_operand.hbm [shape: f32[2,8,32], index: 17, kind: output, shape index: {}]  }
   0x1   :  { %3044 = sst [smem:[#allocation22_spill]] %s3006_s0 }
   0x2   :  { %3045 = sst [smem:[#allocation23_spill]] %s3007_s1 }
   0x3   :  { %3046 = sst [smem:[#allocation24_spill]] %s3008_s2 }
   0x4   :  { %3047 = sst [smem:[#allocation25_spill]] %s3009_s3 }
   0x5   :  { %3048 = sst [smem:[#allocation26_spill]] %s3010_s4 }
   0x6   :  { %3049 = sst [smem:[#allocation27_spill]] %s3013_s7 }
   0x7   :  { %3050 = sst [smem:[#allocation28_spill]] %s3015_s9 }
   0x8   :  { %3051 = sst [smem:[#allocation29_spill]] %s3016_s10 }
   0x9   :  { %3052 = sst [smem:[#allocation30_spill]] %s3019_s13 }
   0xa   :  { %3053 = sst [smem:[#allocation31_spill]] %s3020_s14 }
   0xb   :  { %3054 = sst [smem:[#allocation32_spill]] %s3021_s15 }
   0xc   :  { %3055 = sst [smem:[#allocation33_spill]] %s3022_s16 }
   0xd   :  { %3056 = sst [smem:[#allocation34_spill]] %s3023_s17 }
   0xe   :  { %22 = vsyncpa [#allocation3], 0 }
   0xf   :  { %23 = vsyncpa [#allocation4], 0 }
  0x10   :  { %25 = vsyncpa [#allocation4 + $0x1], 0  ;;  %s2577_s24 = smov 0   ;;  %s2579_s25 = smov 0  }
  0x11   :  { %s2581_s26 = smov 0   ;;  %s2583_s27 = smov 0  }
  0x12   :  { %s2585_s28 = smov 0   ;;  %s2587_s29 = smov 0  }
  0x13   :  { %s2589_s0 = smov 0   ;;  %s2591_s30 = smov 0  }
  0x14 LB: > { %3057 = sst [smem:[#allocation8_spill]] %s2441_s24  ;;  %s2017_s18 = sadd.s32 4294967295, %s2469_s30   ;;  %s2469_s30 = sphi %s2591_s30, %s31_s30   ;;  %s2465_s0 = sphi %s2589_s0, %s3119_s0   ;;  %s2461_s29 = sphi %s2587_s29, %s3118_s29   ;;  %s2457_s28 = sphi %s2585_s28, %s3117_s28   ;;  %s2453_s27 = sphi %s2583_s27, %s3116_s27   ;;  %s2449_s26 = sphi %s2581_s26, %s3115_s26   ;;  %s2445_s25 = sphi %s2579_s25, %s3114_s25   ;;  %s2441_s24 = sphi %s2577_s24, %s3113_s24  }
  0x15   : > { %3058 = sst [smem:[#allocation9_spill]] %s2445_s25  ;;  %s2018_s19 = sadd.s32 4294967294, %s2469_s30  }
  0x16   : > { %3059 = sst [smem:[#allocation10_spill]] %s2449_s26  ;;  %s40_s1 = sadd.s32 1, %s2461_s29 }
  0x17   : > { %3060 = sst [smem:[#allocation11_spill]] %s2453_s27  ;;  %s43_s20 = sadd.s32 1, %s2465_s0 }
  0x18   : > { %3061 = sst [smem:[#allocation12_spill]] %s2457_s28  ;;  %p41_p0 = scmp.ge.s32.totalorder %s40_s1, 2 }
  0x19   : > { %3062 = sst [smem:[#allocation13_spill]] %s2461_s29  ;;  %s482_s21 = sadd.s32 1, %s2449_s26 }
  0x1a   : > { %3063 = sst [smem:[#allocation14_spill]] %s2465_s0  ;;  %p492_p1 = scmp.ne.s32.totalorder %s2449_s26, %s2445_s25 }
  0x1b   : > { %3064 = sst [smem:[#allocation15_spill]] %s2469_s30  ;;  %p493_p2 = scmp.eq.s32.totalorder %s2017_s18, 3 }
  0x1c   : > { %s3121_s1 = smov (%p41_p0, %s40_s1), 0  ;;  %s3123_s20 = smov (!%p41_p0, %s43_s20), %s2465_s0 }
  0x1d   : > { %3065 = sst [smem:[#allocation16_spill]] %s3121_s1  ;;  %p2627_p3 = por %p493_p2, %p492_p1 }
  0x1e   : > { %p498_p4 = scmp.ne.s32.totalorder %s2445_s25, %s2441_s24  ;;  %p45_p5 = scmp.ge.s32.totalorder %s3123_s20, 2 }
  0x1f   : > { %s3066_s22 = scalar_select %p2627_p3, 1, 0 }
  0x20   : > { %p499_p6 = scmp.eq.s32.totalorder %s2018_s19, 3  ;;  %p2019_p7 = scmp.ge.s32.totalorder %s2469_s30, 1 }
  0x21   : > { %3067 = sst [smem:[#allocation17_spill]] %s3066_s22  ;;  %p506_p8 = scmp.lt.s32.totalorder %s2469_s30, 5 }
  0x22   : > { %s3125_s20 = smov (%p45_p5, %s3123_s20), 0  ;;  %p2637_p9 = por %p499_p6, %p498_p4 }
  0x23   : > { %3068 = sst [smem:[#allocation18_spill]] %s3125_s20  ;;  %p2641_p10 = pnand %p2019_p7, %p506_p8 }
  0x24   : > { %s3069_s23 = scalar_select %p2637_p9, 1, 0 }
  0x25   : > { %s3071_s29 = scalar_select %p2641_p10, 1, 0 }
  0x26   : > { %3070 = sst [smem:[#allocation19_spill]] %s3069_s23  ;;  %s479_s1 = ssub.s32 %s2465_s0, %s3125_s20 }
  0x27   : > { %p480_p11 = scmp.eq.s32.totalorder %s479_s1, 0  ;;  %p2219_p12 = pneg %p2641_p10 }
  0x28   : > { %p2649_p13 = scmp.eq.s32.totalorder %s2017_s18, 0  ;;  %s2471_s30 = smov [#allocation2]  }
  0x29   : > { %s2654_s24 = scalar_select %p480_p11, %s2449_s26, %s482_s21  }
  0x2a   : > { %s3072_s19 = scalar_select %p2649_p13, 1, 0 }
  0x2b   : > { %3073 = sst [smem:[#allocation20_spill]] %s2654_s24  ;;  %s522_s17 = sshll.u32 %s2471_s30, 4  ;;  %s523_s17 = int_to_ptr.vmem [resolvable:$true] %s522_s17 }
  0x2c   : > { %p2658_p0 = pnand %p2649_p13, %p2219_p12  ;;  %s3075_s4 = sld [smem:[#allocation26_spill]] }
  0x2e   : > { %p2345_p2 = pneg %p2658_p0 }
  0x32   : > { %s2343_s0 = scalar_lea.hbm %s3075_s4, 16 }
  0x33   : > { %p2344_p1 = scmp.ne.s32.totalorder %s3075_s4, %s2343_s0  ;;  %p2350_p6 = scmp.lt.u32.totalorder %s2343_s0, %s3075_s4 }
  0x35   : > { %p2346_p4 = pnand %p2345_p2, %p2344_p1 }
  0x37   : > { %p2347_p5 = pneg %p2346_p4 }
  0x39   : > { %p2352_p7 = pnand %p2350_p6, %p2347_p5 }
  0x3b   : > { %2355 = shalt.err (!%p2352_p7)
}
  0x3c   : > { %s2356_s24 = scalar_lea.vmem %s523_s17, 16  ;;  %s2363_s20 = scalar_lea.vmem %s523_s17, 32 }
  0x3d   : > { %p2357_p8 = scmp.ne.s32.totalorder %s523_s17, %s2356_s24  ;;  %p2364_p9 = scmp.lt.s32.totalorder %s523_s17, %s523_s17 }
  0x3e   : > { %p2365_p3 = scmp.lt.s32.totalorder %s2363_s20, %s2356_s24 }
  0x3f   : > { %p2359_p11 = pnand %p2357_p8, %p2345_p2 }
  0x40   : > { %p2366_p13 = por %p2365_p3, %p2364_p9 }
  0x41   : > { %p2360_p12 = pneg %p2359_p11 }
  0x43   : > { %p2367_p10 = pnand %p2366_p13, %p2360_p12 }
  0x45   : > { %2370 = shalt.err (!%p2367_p10)
}
  0x46   : > { %2222 = dma.hbm_to_vmem [thread:$0]  (!%p2658_p0), %s3075_s4, 16, %s523_s17, [#allocation3]  }
  0x47   : > { %p3076_p1 = scmp.ne.s32.totalorder %s3071_s29, 0 }
  0x49   : > { %635 = sbr.rel (%p3076_p1) target bundleno = 4126 (0x101e), region = 88 }
  0x50   : > { %p3077_p4 = scmp.ne.s32.totalorder %s3072_s19, 0 }
  0x52   : > { %2432 = dma.done.wait (%p3077_p4), [#allocation3], 16  }
  0x53   : > { %2434 = vsyncadd (%p3077_p4), [#allocation3], 4294967280  ;;  %s3038_s24 = sand.u32 1, %s2445_s25   ;;  %p737_p3 = scmp.lt.s32.totalorder %s2457_s28, 1 }
  0x54   : > { %s2024_s0 = sshll.u32 %s3038_s24, 3  ;;  %p748_p9 = scmp.lt.s32.totalorder %s2453_s27, 1 }
  0x55   : > { %s2690_s17 = scalar_select %p737_p3, %s2457_s28, 1 }
  0x56   : > { %s2693_s29 = scalar_select %p748_p9, %s2453_s27, 1 }
  0x57   : > { %s2025_s23 = sshll.u32 %s2690_s17, 3  ;;  %s3079_s22 = sld [smem:[#allocation22_spill]] }
  0x58   : > { %s3080_s26 = sld [smem:[#allocation23_spill]]  ;;  %s2074_s13 = sshll.u32 %s2693_s29, 4 }
  0x59   : > { %s3081_s7 = sld [smem:[#allocation27_spill]]  ;;  %s3082_s9 = sld [smem:[#allocation28_spill]] }
  0x5a   : > { %s3085_s27 = sld [smem:[#allocation30_spill]]  ;;  %s2077_s2 = sshll.u32 %s2693_s29, 5 }
  0x5b   : > { %s3087_s15 = sld [smem:[#allocation32_spill]]  ;;  %s3088_s14 = sld [smem:[#allocation33_spill]] }
  0x5c   : > { %s2760_s18 = scalar_lea.vmem [#allocation5], %s2024_s0  ;;  %s3089_s30 = sld [smem:[#allocation11_spill]] }
  0x5d   : > { %s740_s1 = scalar_lea.vmem %s3079_s22, %s2025_s23 }
  0x5e   : > { %s744_s25 = scalar_lea.vmem %s3080_s26, %s2025_s23 }
  0x5f   : > { %s2722_s22 = scalar_lea.vmem %s3081_s7, %s2074_s13  ;;  %s2727_s24 = scalar_lea.vmem %s3082_s9, %s2074_s13 }
  0x60   : > { %3083 = sst [smem:[#allocation21_spill]] %s2727_s24  ;;  %s2744_s7 = scalar_lea.vmem %s3085_s27, %s2074_s13 }
  0x61   : > { %s3086_s9 = sld [smem:[#allocation31_spill]]  ;;  %s2754_s10 = scalar_lea.vmem %s3087_s15, %s2077_s2 }
  0x62   : > { %s791_s19 = scalar_lea.vmem %s3088_s14, %s2693_s29  ;;  %p2035_p10 = scmp.ne.s32.totalorder %s3089_s30, 0 }
  0x63   : > { %v797_v0 = vld [vmem:[%s740_s1] sm:$0xff] (!%p2035_p10)  ;;  %vm800_vm0 = vcmask (!%p2035_p10), 261120   ;;  %v2472_v3 = vmov (!%p2035_p10), 0   ;;  %s3090_s13 = sld [smem:[#allocation25_spill]] (!%p2035_p10) }
  0x64   : > { %796 = sbr.rel (%p2035_p10) target bundleno = 416 (0x1a0), region = 96  ;;  %v801_v1 = vsel (!%p2035_p10), %vm800_vm0, %v797_v0, 0.0  ;;  %v829_v2 = vld [vmem:[%s744_s25] sm:$0xff] (!%p2035_p10)  ;;  %2309 = vset.pattern.permute.xlu1 (!%p2035_p10), %v2472_v3  ;;  %2310 = vset.pattern.permute.xlu0 (!%p2035_p10), %v2472_v3 }
  0x65   : > { %802 = vadd.xlane.f32.xlu0 (!%p2035_p10), %v801_v1  ;;  %832 = vperm.xlu1 (!%p2035_p10), %2309, %v829_v2   ;;  %v2037_v15 = vld [vmem:[#allocation2] ss:$0 sm:$0xff] (!%p2035_p10) }
  0x67   : > { %s783_s24 = scalar_lea.vmem %s3086_s9, %s2693_s29 }
  0x69   : > { %v2036_v13 = vld [vmem:[%s3090_s13] ss:$0 sm:$0xff] (!%p2035_p10) }
  0xe4   : > { %v833_v17 = vpop.permute.xlu1 %832 }
  0xf2   : > { %v803_v4 = vpop.xlane.xlu0 %802 }
  0xf3   : > { %v805_v5 = vmul.f32 0.03125, %v803_v4 }
  0xf5   : > { %v806_v6 = vsub.f32 %v797_v0, %v805_v5 }
  0xf7   : > { %v807_v7 = vmul.f32 %v806_v6, %v806_v6 }
  0xf9   : > { %v808_v8 = vsel %vm800_vm0, %v807_v7, 0.0 }
  0xfa   : > { %809 = vadd.xlane.f32.xlu0 %v808_v8 }
 0x187   : > { %v810_v9 = vpop.xlane.xlu0 %809 }
 0x188   : > { %v811_v10 = vmul.f32 0.03125, %v810_v9 }
 0x18a   : > { %v812_v11 = vadd.f32 1e-05, %v811_v10 }
 0x18c   : > { %2311 = vrsqrt.f32 %v812_v11 }
 0x196   : > { %v2312_v12 = vpop.eup %2311 }
 0x197   : > { %v814_v14 = vmul.f32 %v2312_v12, %v806_v6 }
 0x199   : > { %v821_v16 = vmul.f32 %v2036_v13, %v814_v14 }
 0x19b   : > { %v828_v18 = vadd.f32 %v2037_v15, %v821_v16 }
 0x19d   : > { %v835_v19 = vmul.f32 %v833_v17, %v828_v18 }
 0x19f   : > { %836 = vst.msk [vmem:[%s2760_s18] sm:$0xff] %vm800_vm0, %v835_v19 }
 0x1a0 PF: > { %vm841_vm1 = vcmask 261120   ;;  %v2313_v27 = vld [vmem:[%s2722_s22] sm:$0xff]   ;;  %v2473_v28 = vmov 0.0   ;;  %vm2474_vm2 = vmmov 0   ;;  %v2314_v29 = vld [vmem:[%s2722_s22 + $0x8] sm:$0xff]   ;;  %s3091_s27 = scalar_lea.vmem %s3011_s5, %s2693_s29  ;;  %s3092_s1 = scalar_lea.vmem %s3012_s6, %s2693_s29  ;;  %vm951_vm3 = vcmask 64512  }
 0x1a1   : > { %2113 = vmatprep.subr.bf16.mxu1 %v2473_v28  ;;  %2117 = vmatprep.mubr.msk.bf16.mxu1 %vm2474_vm2, %v2473_v28  ;;  %v2038_v34 = vld [vmem:[%s3091_s27] ss:$0 sm:$0xff]  ;;  %s3093_s21 = scalar_lea.vmem %s3014_s8, %s2693_s29  ;;  %s2475_s20 = smov 120   ;;  %vm1015_vm4 = vcmask 1043456   ;;  %vm1726_vm5 = vcmask 523264  }
 0x1a2   : > { %2114 = vmatpush3.bf16.msra.mxu1 %v2313_v27  ;;  %2127 = vmatprep.subr.bf16.mxu0 %v2473_v28  ;;  %v2039_v36 = vld [vmem:[%s3092_s1] ss:$0 sm:$0xff]  ;;  %s2476_s4 = smov 96   ;;  %s2477_s26 = smov 88  }
 0x1a3   : > { %2115 = vmatprep.subr.bf16.mxu1 %v2473_v28  ;;  %2129 = vmatprep.mubr.msk.bf16.mxu0 %vm2474_vm2, %v2473_v28  ;;  %v2040_v40 = vld [vmem:[%s3093_s21] ss:$0 sm:$0xff]  ;;  %s3094_s16 = sld [smem:[#allocation24_spill]]  ;;  %s2479_s2 = smov 64  }
 0x1a4   : > { %s2480_s9 = smov 80   ;;  %s2481_s13 = smov 112  }
 0x1a5   : > { %s3096_s14 = sld [smem:[#allocation21_spill]]  ;;  %s2482_s25 = smov 48  }
 0x1a6   : > { %v2771_v20 = vld [vmem:[%s2760_s18] sm:$0xff]  ;;  %2116 = vmatpush3.bf16.msra.mxu1 %v2314_v29  ;;  %s2483_s27 = smov 104   ;;  %s2484_s0 = smov 72  }
 0x1a7   : > { %v842_v21 = vsel %vm841_vm1, %v2771_v20, 0.0  ;;  %2121 = vmatprep.subr.bf16.mxu1 %v2473_v28  ;;  %s2485_s30 = smov 40   ;;  %s3097_s15 = sld [smem:[#allocation29_spill]] }
 0x1a8   : > { %843 = vadd.xlane.f32.xlu0 %v842_v21  ;;  %s3106_s1 = sld [smem:[#allocation34_spill]] }
 0x1a9   : > { %s3095_s23 = scalar_lea.vmem %s3094_s16, %s2690_s17  ;;  %s2478_s17 = smov 56  }
 0x1aa   : > { %v2826_v52 = vld [vmem:[%s3095_s23] ss:$0 sm:$0xff] }
 0x1ad   : > { %s3098_s21 = scalar_lea.vmem %s3097_s15, %s2693_s29 }
 0x235   : > { %v844_v22 = vpop.xlane.xlu0 %843 }
 0x236   : > { %v846_v23 = vmul.f32 0.03125, %v844_v22 }
 0x238   : > { %v847_v24 = vsub.f32 %v2771_v20, %v846_v23 }
 0x23a   : > { %v848_v25 = vmul.f32 %v847_v24, %v847_v24 }
 0x23c   : > { %v849_v26 = vsel %vm841_vm1, %v848_v25, 0.0 }
 0x23d   : > { %850 = vadd.xlane.f32.xlu0 %v849_v26  ;;  %v938_v26 = vld [vmem:[%s3096_s14 + $0x4] sm:$0xf] }
 0x23e   : > { %v1175_v27 = vsel %vm1015_vm4, %v938_v26, 0 }
 0x2ca   : > { %v851_v30 = vpop.xlane.xlu0 %850 }
 0x2cb   : > { %v852_v31 = vmul.f32 0.03125, %v851_v30 }
 0x2cd   : > { %v853_v32 = vadd.f32 1e-05, %v852_v31 }
 0x2cf   : > { %2321 = vrsqrt.f32 %v853_v32 }
 0x2d9   : > { %v2322_v33 = vpop.eup %2321 }
 0x2da   : > { %v855_v35 = vmul.f32 %v2322_v33, %v847_v24  ;;  %v937_v24 = vld [vmem:[%s3096_s14] sm:$0xf] }
 0x2db   : > { %v1221_v25 = vsel %vm1015_vm4, %v937_v24, 0 }
 0x2dc   : > { %v862_v37 = vmul.f32 %v2038_v34, %v855_v35 }
 0x2de   : > { %v869_v38 = vadd.f32 %v2039_v36, %v862_v37 }
 0x2e0   : > { %v870_v39 = vpack.c.bf16 %v869_v38, %v869_v38 }
 0x2e2   : > { %2118 = vmatmul.mubr.msk.bf16.vlgmr.msra.gmra.mrb[0].mxu1 %vm841_vm1, %v870_v39 }
 0x2e3   : > { %2123 = vmatprep.mubr.msk.bf16.mxu1 %vm2474_vm2, %v2473_v28 }
 0x3b5   : > { %v931_v41 = vpop.f32.mrb[0].mxu1 }
 0x3b6   : > { %v932_v42 = vadd.f32 %v2040_v40, %v931_v41  ;;  %v2119_v43 = vpop.f32.mrb[1].mxu1 }
 0x3b7   : > { %v934_v44 = vpop.f32.mrb[2].mxu1 }
 0x3b8   : > { %v2805_v45 = vpack.c.bf16 %v932_v42, %v932_v42  ;;  %v2120_v46 = vpop.f32.mrb[3].mxu1 }
 0x3ba   : > { %1060 = vrot.lane.b32.xlu0 %v2805_v45, %s2475_s20  ;;  %949 = vrot.lane.b32.xlu1 %v2805_v45, %s2476_s4 }
 0x3be   : > { %1062 = vrot.lane.b32.xlu1 %v2805_v45, %s2477_s26  ;;  %s3099_s26 = scalar_lea.vmem %s3017_s11, %s2693_s29 }
 0x42c   : > { %v950_v47 = vpop.permute.xlu1 %949  ;;  %v1061_v51 = vpop.permute.xlu0 %1060 }
 0x42d   : > { %v956_v48 = vsel %vm951_vm3, %v950_v47, 0 }
 0x42e   : > { %2122 = vmatpush3.bf16.xpose.msra.mxu1 %v956_v48 }
 0x42f   : > { %2133 = vmatprep.subr.bf16.mxu1 %v2473_v28 }
 0x430   : > { %v1063_v49 = vpop.permute.xlu1 %1062 }
 0x431   : > { %v1068_v50 = vsel %vm951_vm3, %v1063_v49, 0 }
 0x435   : > { %2124 = vmatmul.mubr.msk.bf16.vlgmr.msra.gmra.mrb[4].mxu1 %vm951_vm3, %v2805_v45 }
 0x436   : > { %2134 = vmatpush3.bf16.xpose.msra.mxu1 %v1068_v50  ;;  %2135 = vmatprep.mubr.msk.bf16.mxu1 %vm2474_vm2, %v2473_v28 }
 0x437   : > { %2145 = vmatprep.subr.bf16.mxu1 %v2473_v28 }
 0x43d   : > { %2136 = vmatmul.mubr.msk.bf16.vlgmr.msra.gmra.mrb[8].mxu1 %vm951_vm3, %v1061_v51 }
 0x43e   : > { %2147 = vmatprep.mubr.msk.bf16.mxu1 %vm2474_vm2, %v2473_v28  ;;  %2146 = vmatpush3.bf16.msra.mxu1 %v1175_v27 }
 0x43f   : > { %2157 = vmatprep.subr.bf16.mxu1 %v2473_v28 }
 0x508   : > { %v992_v53 = vpop.f32.mrb[4].mxu1 }
 0x509   : > { %v993_v54 = vadd.f32 %v2826_v52, %v992_v53  ;;  %v2125_v55 = vpop.f32.mrb[5].mxu1 }
 0x50a   : > { %v995_v56 = vpop.f32.mrb[6].mxu1 }
 0x50b   : > { %v2126_v57 = vpop.f32.mrb[7].mxu1  ;;  %v998_v58 = vsel %vm951_vm3, %v993_v54, -inf }
 0x50c   : > { %999 = vmax.xlane.f32.xlu1 %v998_v58 }
 0x510   : > { %v1104_v59 = vpop.f32.mrb[8].mxu1 }
 0x511   : > { %v1105_v60 = vadd.f32 %v2826_v52, %v1104_v59  ;;  %v2137_v61 = vpop.f32.mrb[9].mxu1 }
 0x512   : > { %v1107_v62 = vpop.f32.mrb[10].mxu1 }
 0x513   : > { %v2138_v63 = vpop.f32.mrb[11].mxu1  ;;  %v1110_v0 = vsel %vm951_vm3, %v1105_v60, -inf }
 0x514   : > { %1111 = vmax.xlane.f32.xlu0 %v1110_v0 }
 0x52a   : > { %1122 = vrot.lane.b32.xlu0 %v2805_v45, %s2478_s17 }
 0x599   : > { %v1000_v1 = vpop.xlane.xlu1 %999 }
 0x59a   : > { %v1001_v2 = vsub.f32 %v993_v54, %v1000_v1 }
 0x59c   : > { %v1002_v3 = vmul.f32 1.442695, %v1001_v2 }
 0x59e   : > { %2323 = vpow2.f32 %v1002_v3 }
 0x5a1   : > { %v1112_v4 = vpop.xlane.xlu0 %1111 }
 0x5a2   : > { %v1113_v5 = vsub.f32 %v1105_v60, %v1112_v4 }
 0x5a4   : > { %v1114_v6 = vmul.f32 1.442695, %v1113_v5 }
 0x5a5   : > { %v1123_v17 = vpop.permute.xlu0 %1122 }
 0x5a6   : > { %2325 = vpow2.f32 %v1114_v6  ;;  %v1128_v19 = vsel %vm1015_vm4, %v1123_v17, 0 }
 0x5a8   : > { %v2324_v7 = vpop.eup %2323 }
 0x5a9   : > { %v1004_v8 = vsel %vm951_vm3, %v2324_v7, 0.0 }
 0x5aa   : > { %1005 = vadd.xlane.f32.xlu1 %v1004_v8 }
 0x5b0   : > { %v2326_v9 = vpop.eup %2325 }
 0x5b1   : > { %v1116_v10 = vsel %vm951_vm3, %v2326_v9, 0.0 }
 0x5b2   : > { %1117 = vadd.xlane.f32.xlu1 %v1116_v10 }
 0x5c3   : > { %1010 = vrot.lane.b32.xlu1 %v2805_v45, %s2479_s2  ;;  %s3102_s2 = sld [smem:[#allocation12_spill]] }
 0x5c7   : > { %1265 = vrot.lane.b32.xlu1 %v2805_v45, %s2480_s9 }
 0x5cb   : > { %1263 = vrot.lane.b32.xlu1 %v2805_v45, %s2481_s13 }
 0x637   : > { %v1006_v11 = vpop.xlane.xlu1 %1005 }
 0x638   : > { %2327 = vrcp.f32 %v1006_v11 }
 0x63f   : > { %v1118_v12 = vpop.xlane.xlu1 %1117 }
 0x640   : > { %2329 = vrcp.f32 %v1118_v12 }
 0x642   : > { %v2328_v13 = vpop.eup %2327 }
 0x643   : > { %v1011_v14 = vpop.permute.xlu1 %1010  ;;  %v1008_v15 = vmul.f32 %v2328_v13, %v2324_v7 }
 0x644   : > { %v1017_v16 = vsel %vm1015_vm4, %v1011_v14, 0 }
 0x645   : > { %2128 = vmatpush3.bf16.msra.mxu0 %v1017_v16  ;;  %v1009_v18 = vpack.c.bf16 %v1008_v15, %v1008_v15 }
 0x646   : > { %2139 = vmatprep.subr.bf16.mxu0 %v2473_v28 }
 0x647   : > { %v1266_v34 = vpop.permute.xlu1 %1265 }
 0x648   : > { %2130 = vmatmul.mubr.msk.bf16.vlgmr.msra.gmra.mrb[0].mxu0 %vm951_vm3, %v1009_v18  ;;  %v1271_v39 = vsel %vm951_vm3, %v1266_v34, 0 }
 0x649   : > { %2140 = vmatpush3.bf16.msra.mxu0 %v1128_v19  ;;  %2141 = vmatprep.mubr.msk.bf16.mxu0 %vm2474_vm2, %v2473_v28 }
 0x64a   : > { %v2330_v21 = vpop.eup %2329  ;;  %2151 = vmatprep.subr.bf16.mxu0 %v2473_v28 }
 0x64b   : > { %v1120_v22 = vmul.f32 %v2330_v21, %v2326_v9  ;;  %v1264_v41 = vpop.permute.xlu1 %1263  ;;  %v939_v9 = vld [vmem:[%s3096_s14 + $0x8] sm:$0xf] }
 0x64c   : > { %v1378_v10 = vsel %vm1015_vm4, %v939_v9, 0  ;;  %v2318_v9 = vld [vmem:[%s2754_s10 + $0x8] sm:$0xff]  }
 0x64d   : > { %v1121_v23 = vpack.c.bf16 %v1120_v22, %v1120_v22 }
 0x650   : > { %2142 = vmatmul.mubr.msk.bf16.vlgmr.msra.gmra.mrb[4].mxu0 %vm951_vm3, %v1121_v23 }
 0x651   : > { %2153 = vmatprep.mubr.msk.bf16.mxu0 %vm2474_vm2, %v2473_v28  ;;  %2152 = vmatpush3.bf16.msra.mxu0 %v1221_v25 }
 0x652   : > { %2163 = vmatprep.subr.bf16.mxu0 %v2473_v28 }
 0x71b   : > { %v1053_v29 = vpop.f32.mrb[0].mxu0 }
 0x71c   : > { %v1059_v30 = vpack.c.bf16 %v1053_v29, %v1053_v29  ;;  %v2131_v31 = vpop.f32.mrb[1].mxu0  ;;  %v940_v29 = vld [vmem:[%s3096_s14 + $0xc] sm:$0xf] }
 0x71d   : > { %v1056_v32 = vpop.f32.mrb[2].mxu0 }
 0x71e   : > { %v2132_v33 = vpop.f32.mrb[3].mxu0  ;;  %2154 = vmatmul.mubr.msk.bf16.vlgmr.msra.gmra.mrb[8].mxu0 %vm951_vm3, %v1059_v30 }
 0x71f   : > { %2165 = vmatprep.mubr.msk.bf16.mxu0 %vm2474_vm2, %v2473_v28 }
 0x723   : > { %v1164_v35 = vpop.f32.mrb[4].mxu0 }
 0x724   : > { %v1170_v36 = vpack.c.bf16 %v1164_v35, %v1164_v35  ;;  %v2143_v37 = vpop.f32.mrb[5].mxu0 }
 0x725   : > { %v1167_v38 = vpop.f32.mrb[6].mxu0 }
 0x726   : > { %v2144_v40 = vpop.f32.mrb[7].mxu0  ;;  %2148 = vmatmul.mubr.msk.bf16.vlgmr.msra.gmra.mrb[12].mxu1 %vm951_vm3, %v1170_v36 }
 0x727   : > { %2158 = vmatpush3.bf16.xpose.msra.mxu1 %v1271_v39  ;;  %2159 = vmatprep.mubr.msk.bf16.mxu1 %vm2474_vm2, %v2473_v28 }
 0x728   : > { %2169 = vmatprep.subr.bf16.mxu1 %v2473_v28 }
 0x72e   : > { %2160 = vmatmul.mubr.msk.bf16.vlgmr.msra.gmra.mrb[16].mxu1 %vm951_vm3, %v1264_v41 }
 0x72f   : > { %2171 = vmatprep.mubr.msk.bf16.mxu1 %vm2474_vm2, %v2473_v28  ;;  %2170 = vmatpush3.bf16.msra.mxu1 %v1378_v10  ;;  %v2319_v10 = vld [vmem:[%s2754_s10 + $0x10] sm:$0xff]  }
 0x730   : > { %2181 = vmatprep.subr.bf16.mxu1 %v2473_v28 }
 0x7f1   : > { %v1257_v42 = vpop.f32.mrb[8].mxu0 }
 0x7f2   : > { %v2155_v43 = vpop.f32.mrb[9].mxu0 }
 0x7f3   : > { %v1260_v44 = vpop.f32.mrb[10].mxu0 }
 0x7f4   : > { %v2156_v46 = vpop.f32.mrb[11].mxu0 }
 0x7f9   : > { %v1211_v47 = vpop.f32.mrb[12].mxu1 }
 0x7fa   : > { %v2865_v48 = vadd.f32 %v1257_v42, %v1211_v47  ;;  %v2149_v49 = vpop.f32.mrb[13].mxu1 }
 0x7fb   : > { %v1214_v50 = vpop.f32.mrb[14].mxu1  ;;  %v2057_v49 = vld [vmem:[%s3098_s21] ss:$0 sm:$0xff]  ;;  %s2486_s21 = smov [#allocation5]  }
 0x7fc   : > { %v2150_v51 = vpop.f32.mrb[15].mxu1  ;;  %s2375_s20 = sshll.u32 %s2486_s21, 4  ;;  %s2376_s20 = int_to_ptr.vmem [resolvable:$false] %s2375_s20 }
 0x7fd   : > { %s2377_s4 = scalar_lea.vmem %s2376_s20, 256 }
 0x801   : > { %v1307_v53 = vpop.f32.mrb[16].mxu1 }
 0x802   : > { %v1308_v54 = vadd.f32 %v2826_v52, %v1307_v53  ;;  %v2161_v55 = vpop.f32.mrb[17].mxu1 }
 0x803   : > { %v1310_v56 = vpop.f32.mrb[18].mxu1 }
 0x804   : > { %v2162_v57 = vpop.f32.mrb[19].mxu1  ;;  %v1313_v58 = vsel %vm951_vm3, %v1308_v54, -inf }
 0x805   : > { %1314 = vmax.xlane.f32.xlu1 %v1313_v58 }
 0x816   : > { %1325 = vrot.lane.b32.xlu1 %v2805_v45, %s2482_s25  ;;  %s2071_s25 = sshll.u32 %s3102_s2, 7 }
 0x817   : > { %s2949_s22 = scalar_lea.hbm %s3106_s1, %s2071_s25 }
 0x81a   : > { %1421 = vrot.lane.b32.xlu1 %v2805_v45, %s2483_s27  ;;  %s1794_s27 = sshll.u32 %s2760_s18, 4  ;;  %s2951_s27 = int_to_ptr.vmem [resolvable:$true] %s1794_s27 }
 0x81b   : > { %s2371_s15 = scalar_lea.vmem %s2951_s27, 128  ;;  %p2378_p6 = scmp.lt.s32.totalorder %s2951_s27, %s2376_s20 }
 0x81c   : > { %p2372_p13 = scmp.ne.s32.totalorder %s2951_s27, %s2371_s15  ;;  %p2379_p7 = scmp.lt.s32.totalorder %s2377_s4, %s2371_s15 }
 0x81e   : > { %p2380_p8 = por %p2379_p7, %p2378_p6 }
 0x892   : > { %v1315_v59 = vpop.xlane.xlu1 %1314 }
 0x893   : > { %v1316_v60 = vsub.f32 %v1308_v54, %v1315_v59 }
 0x895   : > { %v1317_v61 = vmul.f32 1.442695, %v1316_v60 }
 0x896   : > { %v1326_v62 = vpop.permute.xlu1 %1325 }
 0x897   : > { %2331 = vpow2.f32 %v1317_v61  ;;  %v1331_v63 = vsel %vm1015_vm4, %v1326_v62, 0  ;;  %v2315_v61 = vld [vmem:[%s2744_s7] sm:$0xff]   ;;  %v2316_v62 = vld [vmem:[%s2744_s7 + $0x8] sm:$0xff]   ;;  %s3100_s7 = scalar_lea.vmem %s3018_s12, %s2693_s29 }
 0x898   : > { %2164 = vmatpush3.bf16.msra.mxu0 %v1331_v63 }
 0x899   : > { %2175 = vmatprep.subr.bf16.mxu0 %v2473_v28 }
 0x89a   : > { %v1422_v8 = vpop.permute.xlu1 %1421 }
 0x8a1   : > { %v2332_v0 = vpop.eup %2331 }
 0x8a2   : > { %v1319_v1 = vsel %vm951_vm3, %v2332_v0, 0.0 }
 0x8a3   : > { %1320 = vadd.xlane.f32.xlu0 %v1319_v1 }
 0x8b9   : > { %1423 = vrot.lane.b32.xlu0 %v2805_v45, %s2484_s0 }
 0x930   : > { %v1321_v2 = vpop.xlane.xlu0 %1320 }
 0x931   : > { %2333 = vrcp.f32 %v1321_v2  ;;  %v2058_v2 = vld [vmem:[%s3099_s26] ss:$0 sm:$0xff] }
 0x934   : > { %v1424_v5 = vpop.permute.xlu0 %1423 }
 0x935   : > { %v1429_v7 = vsel %vm951_vm3, %v1424_v5, 0 }
 0x93b   : > { %v2334_v3 = vpop.eup %2333 }
 0x93c   : > { %v1323_v4 = vmul.f32 %v2334_v3, %v2332_v0 }
 0x93e   : > { %v1324_v6 = vpack.c.bf16 %v1323_v4, %v1323_v4  ;;  %v2059_v4 = vld [vmem:[%s3100_s7] ss:$0 sm:$0xff] }
 0x940   : > { %2166 = vmatmul.mubr.msk.bf16.vlgmr.msra.gmra.mrb[12].mxu0 %vm951_vm3, %v1324_v6 }
 0x941   : > { %2176 = vmatpush3.bf16.xpose.msra.mxu0 %v1429_v7  ;;  %2177 = vmatprep.mubr.msk.bf16.mxu0 %vm2474_vm2, %v2473_v28 }
 0x942   : > { %2187 = vmatprep.subr.bf16.mxu0 %v2473_v28 }
 0x948   : > { %2178 = vmatmul.mubr.msk.bf16.vlgmr.msra.gmra.mrb[16].mxu0 %vm951_vm3, %v1422_v8  ;;  %v2317_v8 = vld [vmem:[%s2754_s10] sm:$0xff]  }
 0x949   : > { %2189 = vmatprep.mubr.msk.bf16.mxu0 %vm2474_vm2, %v2473_v28 }
 0xa13   : > { %v1367_v11 = vpop.f32.mrb[12].mxu0 }
 0xa14   : > { %v1373_v12 = vpack.c.bf16 %v1367_v11, %v1367_v11  ;;  %v2167_v13 = vpop.f32.mrb[13].mxu0  ;;  %v2320_v11 = vld [vmem:[%s2754_s10 + $0x18] sm:$0xff]   ;;  %s3103_s10 = sld [smem:[#allocation9_spill]] }
 0xa15   : > { %v1370_v14 = vpop.f32.mrb[14].mxu0 }
 0xa16   : > { %v2168_v15 = vpop.f32.mrb[15].mxu0  ;;  %2172 = vmatmul.mubr.msk.bf16.vlgmr.msra.gmra.mrb[20].mxu1 %vm951_vm3, %v1373_v12  ;;  %v2060_v12 = vld [vmem:[%s783_s24] ss:$0 sm:$0xff]  ;;  %s3104_s24 = sld [smem:[#allocation17_spill]] }
 0xa17   : > { %2183 = vmatprep.mubr.msk.bf16.mxu1 %vm2474_vm2, %v2473_v28 }
 0xa1a   : > { %s3107_s29 = sand.u32 1, %s3103_s10  }
 0xa1b   : > { %v1465_v16 = vpop.f32.mrb[16].mxu0 }
 0xa1c   : > { %v1466_v17 = vadd.f32 %v2826_v52, %v1465_v16  ;;  %v2179_v18 = vpop.f32.mrb[17].mxu0  ;;  %v1536_v52 = vsel %vm1015_vm4, %v940_v29, 0  ;;  %p3108_p0 = scmp.ne.s32.totalorder %s3104_s24, 0 }
 0xa1d   : > { %v1468_v19 = vpop.f32.mrb[18].mxu0  ;;  %2188 = vmatpush3.bf16.msra.mxu0 %v1536_v52  ;;  %v2069_v52 = vld [vmem:[%s791_s19] ss:$0 sm:$0xff]  ;;  %s1781_s19 = scalar_lea.sflag [#allocation4], %s3107_s29 }
 0xa1e   : > { %v2180_v21 = vpop.f32.mrb[19].mxu0  ;;  %v1471_v22 = vsel %vm951_vm3, %v1466_v17, -inf  ;;  %2201 = vmatprep.subr.bf16.mxu0 %v2473_v28  ;;  %p2373_p2 = pnand %p2372_p13, %p3108_p0 }
 0xa1f   : > { %1472 = vmax.xlane.f32.xlu1 %v1471_v22 }
 0xa20   : > { %p2374_p5 = pneg %p2373_p2 }
 0xa22   : > { %p2381_p11 = pnand %p2380_p8, %p2374_p5 }
 0xaac   : > { %v1473_v23 = vpop.xlane.xlu1 %1472 }
 0xaad   : > { %v1474_v24 = vsub.f32 %v1466_v17, %v1473_v23 }
 0xaaf   : > { %v1475_v25 = vmul.f32 1.442695, %v1474_v24 }
 0xab1   : > { %2335 = vpow2.f32 %v1475_v25 }
 0xabb   : > { %v2336_v26 = vpop.eup %2335 }
 0xabc   : > { %v1477_v27 = vsel %vm951_vm3, %v2336_v26, 0.0 }
 0xabd   : > { %1478 = vadd.xlane.f32.xlu0 %v1477_v27 }
 0xad3   : > { %1483 = vrot.lane.b32.xlu0 %v2805_v45, %s2485_s30 }
 0xae9   : > { %v1414_v30 = vpop.f32.mrb[20].mxu1 }
 0xaea   : > { %v1420_v31 = vadd.f32 %v1414_v30, %v2865_v48  ;;  %v2173_v32 = vpop.f32.mrb[21].mxu1 }
 0xaeb   : > { %v1417_v33 = vpop.f32.mrb[22].mxu1 }
 0xaec   : > { %v2174_v34 = vpop.f32.mrb[23].mxu1 }
 0xb4a   : > { %v1479_v35 = vpop.xlane.xlu0 %1478 }
 0xb4b   : > { %2337 = vrcp.f32 %v1479_v35 }
 0xb4e   : > { %v1484_v36 = vpop.permute.xlu0 %1483 }
 0xb4f   : > { %v1489_v37 = vsel %vm1015_vm4, %v1484_v36, 0 }
 0xb50   : > { %2182 = vmatpush3.bf16.msra.mxu1 %v1489_v37 }
 0xb51   : > { %2193 = vmatprep.subr.bf16.mxu1 %v2473_v28 }
 0xb55   : > { %v2338_v45 = vpop.eup %2337 }
 0xb56   : > { %v1481_v38 = vmul.f32 %v2338_v45, %v2336_v26 }
 0xb58   : > { %v1482_v39 = vpack.c.bf16 %v1481_v38, %v1481_v38 }
 0xb5a   : > { %2184 = vmatmul.mubr.msk.bf16.vlgmr.msra.gmra.mrb[24].mxu1 %vm951_vm3, %v1482_v39 }
 0xb5b   : > { %2197 = vmatprep.mubr.msk.bf16.mxu1 %vm2474_vm2, %v2473_v28  ;;  %2194 = vmatpush3.bf16.msra.mxu1 %v2315_v61 }
 0xb5c   : > { %2195 = vmatprep.subr.bf16.mxu1 %v2473_v28 }
 0xb5f   : > { %2196 = vmatpush3.bf16.msra.mxu1 %v2316_v62 }
 0xc2d   : > { %v1525_v40 = vpop.f32.mrb[24].mxu1 }
 0xc2e   : > { %v1531_v41 = vpack.c.bf16 %v1525_v40, %v1525_v40  ;;  %v2185_v42 = vpop.f32.mrb[25].mxu1 }
 0xc2f   : > { %v1528_v43 = vpop.f32.mrb[26].mxu1 }
 0xc30   : > { %v2186_v44 = vpop.f32.mrb[27].mxu1  ;;  %2190 = vmatmul.mubr.msk.bf16.vlgmr.msra.gmra.mrb[20].mxu0 %vm951_vm3, %v1531_v41 }
 0xc31   : > { %2209 = vmatprep.mubr.msk.bf16.mxu0 %vm2474_vm2, %v2473_v28  ;;  %2202 = vmatpush3.bf16.msra.mxu0 %v2317_v8 }
 0xc32   : > { %2203 = vmatprep.subr.bf16.mxu0 %v2473_v28 }
 0xc35   : > { %2204 = vmatpush3.bf16.msra.mxu0 %v2318_v9 }
 0xc36   : > { %2205 = vmatprep.subr.bf16.mxu0 %v2473_v28 }
 0xc39   : > { %2206 = vmatpush3.bf16.msra.mxu0 %v2319_v10 }
 0xc3a   : > { %2207 = vmatprep.subr.bf16.mxu0 %v2473_v28 }
 0xc3d   : > { %2208 = vmatpush3.bf16.msra.mxu0 %v2320_v11 }
 0xd03   : > { %v1572_v46 = vpop.f32.mrb[20].mxu0 }
 0xd04   : > { %v1578_v47 = vadd.f32 %v1572_v46, %v1420_v31  ;;  %v2191_v48 = vpop.f32.mrb[21].mxu0 }
 0xd05   : > { %v1575_v50 = vpop.f32.mrb[22].mxu0 }
 0xd06   : > { %v1579_v51 = vadd.f32 %v1578_v47, %v2771_v20  ;;  %v2192_v53 = vpop.f32.mrb[23].mxu0 }
 0xd08   : > { %v1587_v54 = vadd.f32 %v2057_v49, %v1579_v51 }
 0xd0a   : > { %v1590_v55 = vsel %vm841_vm1, %v1587_v54, 0.0 }
 0xd0b   : > { %1591 = vadd.xlane.f32.xlu1 %v1590_v55 }
 0xd98   : > { %v1592_v56 = vpop.xlane.xlu1 %1591 }
 0xd99   : > { %v1593_v57 = vmul.f32 0.03125, %v1592_v56 }
 0xd9b   : > { %v1594_v58 = vsub.f32 %v1587_v54, %v1593_v57 }
 0xd9d   : > { %v1595_v59 = vmul.f32 %v1594_v58, %v1594_v58 }
 0xd9f   : > { %v1596_v60 = vsel %vm841_vm1, %v1595_v59, 0.0 }
 0xda0   : > { %1597 = vadd.xlane.f32.xlu1 %v1596_v60 }
 0xe2d   : > { %v1598_v20 = vpop.xlane.xlu1 %1597 }
 0xe2e   : > { %v1599_v63 = vmul.f32 0.03125, %v1598_v20 }
 0xe30   : > { %v1600_v0 = vadd.f32 1e-05, %v1599_v63 }
 0xe32   : > { %2339 = vrsqrt.f32 %v1600_v0 }
 0xe3c   : > { %v2340_v1 = vpop.eup %2339 }
 0xe3d   : > { %v1602_v3 = vmul.f32 %v2340_v1, %v1594_v58 }
 0xe3f   : > { %v1609_v5 = vmul.f32 %v2058_v2, %v1602_v3 }
 0xe41   : > { %v1616_v6 = vadd.f32 %v2059_v4, %v1609_v5 }
 0xe43   : > { %v1617_v7 = vpack.c.bf16 %v1616_v6, %v1616_v6 }
 0xe45   : > { %2198 = vmatmul.mubr.msk.bf16.vlgmr.msra.gmra.mrb[28].mxu1 %vm841_vm1, %v1617_v7 }
 0xf18   : > { %v1678_v13 = vpop.f32.mrb[28].mxu1 }
 0xf19   : > { %v1679_v14 = vadd.f32 %v2060_v12, %v1678_v13  ;;  %v2199_v15 = vpop.f32.mrb[29].mxu1 }
 0xf1a   : > { %v1681_v16 = vpop.f32.mrb[30].mxu1 }
 0xf1b   : > { %v1684_v17 = vmul.f32 %v1679_v14, %v1679_v14  ;;  %v2200_v18 = vpop.f32.mrb[31].mxu1 }
 0xf1d   : > { %v1685_v19 = vmul.f32 %v1684_v17, %v1679_v14 }
 0xf1f   : > { %v1686_v21 = vmul.f32 0.044715, %v1685_v19 }
 0xf21   : > { %v1687_v22 = vadd.f32 %v1686_v21, %v1679_v14 }
 0xf23   : > { %v1688_v28 = vmul.f32 0.7978846, %v1687_v22 }
 0xf25   : > { %2341 = vtanh.f32 %v1688_v28 }
 0xf2f   : > { %v2342_v23 = vpop.eup %2341 }
 0xf30   : > { %v1690_v24 = vadd.f32 1.0, %v2342_v23 }
 0xf32   : > { %v1691_v25 = vmul.f32 0.5, %v1690_v24 }
 0xf34   : > { %v1692_v26 = vmul.f32 %v1691_v25, %v1679_v14 }
 0xf36   : > { %v1693_v27 = vpack.c.bf16 %v1692_v26, %v1692_v26 }
 0xf38   : > { %2210 = vmatmul.mubr.msk.bf16.vlgmr.msra.gmra.mrb[24].mxu0 %vm1726_vm5, %v1693_v27 }
0x100b   : > { %v1764_v29 = vpop.f32.mrb[24].mxu0 }
0x100c   : > { %v1770_v30 = vadd.f32 %v1764_v29, %v1587_v54  ;;  %v2211_v31 = vpop.f32.mrb[25].mxu0 }
0x100d   : > { %v1767_v32 = vpop.f32.mrb[26].mxu0 }
0x100e   : > { %v1778_v33 = vadd.f32 %v2069_v52, %v1770_v30  ;;  %v2212_v34 = vpop.f32.mrb[27].mxu0 }
0x1010   : > { %1779 = vst.msk [vmem:[%s2760_s18] sm:$0xff] %vm841_vm1, %v1778_v33 }
0x1011   : > { %2384 = shalt.err (!%p2381_p11)
}
0x1012   : > { %s2385_s18 = scalar_lea.hbm %s2949_s22, 128  ;;  %s2389_s28 = scalar_lea.hbm %s3106_s1, 256 }
0x1013   : > { %p2386_p12 = scmp.ne.s32.totalorder %s2949_s22, %s2385_s18  ;;  %p2390_p3 = scmp.lt.u32.totalorder %s2949_s22, %s3106_s1 }
0x1014   : > { %p2391_p9 = scmp.lt.u32.totalorder %s2389_s28, %s2385_s18  ;;  %p2393_p13 = scmp.lt.u32.totalorder %s2385_s18, %s2949_s22 }
0x1015   : > { %p2387_p1 = pnand %p2386_p12, %p3108_p0 }
0x1016   : > { %p2392_p10 = por %p2391_p9, %p2390_p3 }
0x1017   : > { %p2388_p4 = pneg %p2387_p1 }
0x1018   : > { %p2394_p2 = por %p2393_p13, %p2392_p10 }
0x101a   : > { %p2395_p5 = pnand %p2394_p2, %p2388_p4 }
0x101c   : > { %2398 = shalt.err (!%p2395_p5)
}
0x101d   : > { %2217 = dma.vmem_to_hbm [thread:$0]  (%p3108_p0), %s2951_s27, 128, %s2949_s22, %s1781_s19  }
0x101e PF: > { %s3109_s23 = sld [smem:[#allocation15_spill]]  ;;  %s3110_s17 = sld [smem:[#allocation8_spill]] }
0x101f   : > { %s3111_s2 = sld [smem:[#allocation19_spill]] }
0x1024   : > { %p2229_p6 = scmp.ge.s32.totalorder %s3109_s23, 2  ;;  %s1806_s10 = sand.u32 1, %s3110_s17  }
0x1025   : > { %p3112_p7 = scmp.ne.s32.totalorder %s3111_s2, 0  ;;  %s1807_s9 = scalar_lea.sflag [#allocation4], %s1806_s10 }
0x1027   : > { %p2224_p8 = pnand %p2229_p6, %p3112_p7 }
0x1029   : > { %2436 = dma.done.wait (!%p2224_p8), %s1807_s9, 128  }
0x102a   : > { %2438 = vsyncadd (!%p2224_p8), %s1807_s9, 4294967168  ;;  %s31_s30 = sadd.s32 1, %s3109_s23   ;;  %s3113_s24 = sld [smem:[#allocation9_spill]] }
0x102b   : > { %p28_p11 = scmp.ge.s32.totalorder %s31_s30, 6   ;;  %s3114_s25 = sld [smem:[#allocation10_spill]] }
0x102c   : > { %s3115_s26 = sld [smem:[#allocation20_spill]]  ;;  %s3116_s27 = sld [smem:[#allocation13_spill]] }
0x102d   : > { %s3117_s28 = sld [smem:[#allocation14_spill]]  ;;  %s3118_s29 = sld [smem:[#allocation16_spill]] }
0x102e   : > { %s3119_s0 = sld [smem:[#allocation18_spill]]  ;;  %30 = sbr.rel (!%p28_p11) target bundleno = 20 (0x14), region = 174 }
0x1035   :  { %1812 = vsyncpa [#allocation3], 1 }
0x1036   :  { %1814 = vsyncpa [#allocation3 + $0x1], 1 }
0x1037   :  { %1815 = vsyncpa [#allocation4], 1 }
0x1038   :  { %1817 = vsyncpa [#allocation4 + $0x1], 1 }

</bundles_post_ra>
